<compile_context>
chip_gen: v7x
topology: tpu7x:2x2x1
jax: 0.10.0
libtpu: 0.0.40
codegen_flags: <defaults>
</compile_context>

<pallas_src>
import functools

import jax
import jax.numpy as jnp
from jax.experimental import pallas as pl
from jax.experimental.pallas import tpu as pltpu

LANE = 128


def round_up(x, m):
    return (x + m - 1) // m * m


# ------------------------------ per-device config ---------------------------- #
def make_config(batch):
    """Static per-TPU-generation tuning knobs."""
    kind = jax.devices()[0].device_kind.lower()
    is_v7 = ("v7" in kind) or ("7x" in kind)
    is_v6 = "v6" in kind
    is_v5e = ("v5e" in kind) or ("v5 lite" in kind) or ("v5litepod" in kind)
    multi_tc = is_v7 or ("v4" in kind) or ("v5p" in kind)
    if is_v7:
        vmem = 48 * 1024 * 1024           # 64 MiB physical per TC -> leave headroom
    elif is_v6 or is_v5e or ("v5p" in kind) or ("v4" in kind):
        vmem = 96 * 1024 * 1024           # 128 MiB physical
    else:
        vmem = 32 * 1024 * 1024
    try:                                   # refine from hardware with 25% headroom
        cap = pltpu.get_tpu_info().vmem_capacity_bytes
        vmem = min(vmem, int(cap) * 3 // 4)
    except Exception:
        pass
    # One batch tile per TensorCore, but never let TB (rows per tile) drop below 8.
    nb = 2 if (multi_tc and batch % 16 == 0) else 1
    return dict(
        nb=nb,
        vmem=vmem,
        bf16_elem=(is_v6 or is_v7),        # bf16 VPU/EUP only on v6e / v7x
        logits_dtype=(jnp.bfloat16 if is_v5e else jnp.float32),
    )


# --------------------------- generic tiled matmul --------------------------- #
def matmul_bias_kernel(x_ref, w_ref, b_ref, o_ref, acc_ref):
    k = pl.program_id(2)

    @pl.when(k == 0)
    def _():
        acc_ref[...] = jnp.zeros_like(acc_ref)

    acc_ref[...] += jnp.dot(x_ref[...], w_ref[...],
                            preferred_element_type=jnp.float32)

    @pl.when(k == pl.num_programs(2) - 1)
    def _():
        o_ref[...] = (acc_ref[...] + b_ref[...]).astype(o_ref.dtype)


def tiled_matmul_bias(x, w, b, *, tm=256, out_dtype=jnp.float32,
                      vmem_limit=64 * 1024 * 1024):
    """x:(M,K) @ w:(K,N) + b:(1,N) -> (M,N) via M/N/K-tiled MXU matmul (bf16 operands)."""
    M, K = x.shape
    Np = w.shape[1]
    tn = 256 if Np % 256 == 0 else 128
    tk = 512 if (K > 512 and K % 512 == 0) else K
    x = x.astype(jnp.bfloat16)
    w = w.astype(jnp.bfloat16)
    M8 = round_up(M, 8)
    tm = min(tm, M8)
    Mp = round_up(M8, tm)
    if Mp != M:
        x = jnp.pad(x, ((0, Mp - M), (0, 0)))
    out = pl.pallas_call(
        matmul_bias_kernel,
        out_shape=jax.ShapeDtypeStruct((Mp, Np), out_dtype),
        grid_spec=pltpu.PrefetchScalarGridSpec(
            num_scalar_prefetch=0,
            grid=(Mp // tm, Np // tn, K // tk),
            in_specs=[
                pl.BlockSpec((tm, tk), lambda i, j, k: (i, k)),
                pl.BlockSpec((tk, tn), lambda i, j, k: (k, j)),
                pl.BlockSpec((1, tn), lambda i, j, k: (0, j)),
            ],
            out_specs=pl.BlockSpec((tm, tn), lambda i, j, k: (i, j)),
            scratch_shapes=[pltpu.VMEM((tm, tn), jnp.float32)],
        ),
        compiler_params=pltpu.CompilerParams(
            dimension_semantics=("parallel", "parallel", "arbitrary"),
            vmem_limit_bytes=vmem_limit),
    )(x, w, b)
    return out[:M]


# ----------------------------- encoder (stand-in) --------------------------- #
def encoder_forward(images, kp, cfg):
    """permute(0,2,3,1).view(B,-1,C) then a 1x1 projection to encoder_dim (padded)."""
    B, C, H, W = images.shape
    x = jnp.transpose(images, (0, 2, 3, 1)).reshape(B * H * W, C)
    out = tiled_matmul_bias(x, kp['enc_w'], kp['enc_b'],
                            out_dtype=jnp.bfloat16, vmem_limit=cfg['vmem'])
    Dencp = kp['enc_w'].shape[1]
    return out.reshape(B, H * W, Dencp)                      # (B, P, Dencp) bf16


# ----------------------------- decoder step kernel -------------------------- #
def decoder_step_kernel(
    gemb_ref,      # (1, 1, TB, 4*Dp) f32   embeds[:, s] @ W_ih_emb + (b_ih + b_hh)
    feat_ref,      # (nb, TB, Pp, Dencp) bf16  VMEM-resident (single copy)
    uw_ref,        # (Dencp, Ap)      bf16  attention U
    ww_ref,        # (Dp, Ap)         bf16  attention W
    awb_ref,       # (1, Ap)          f32   U.bias + W.bias (A.bias dropped: shift-inv.)
    av_ref,        # (1, Ap)          f32   attention A weight row
    initw_ref,     # (Dencp, 2*Dp)    bf16  [init_h | init_c] fused
    initb_ref,     # (1, 2*Dp)        f32
    wchh_ref,      # (Dencp+Dp, 4*Dp) bf16  fused [W_ih_ctx ; W_hh], gate-aligned
    hseq_ref,      # out (1, 1, TB, Dp) bf16
    alphas_ref,    # out (1, 1, TB, Pp) f32
    h_ref, c_ref, u_ref,   # scratch: (TB,Dp) f32, (TB,Dp) f32, (TB,Pp,Ap) f32|bf16
    *, p_real, dp, use_bf16_elem,
):
    b = pl.program_id(0)                     # batch-tile axis ("parallel")
    s = pl.program_id(1)                     # time axis ("arbitrary", sequential)
    bf = jnp.bfloat16
    f32 = jnp.float32
    feats = feat_ref[b]                      # (TB, Pp, Dencp) bf16

    @pl.when(s == 0)
    def _init():
        # init_hidden_state: mean over the *real* pixels (padded pixel rows are zero).
        mean_f = jnp.sum(feats.astype(f32), axis=1) * (1.0 / p_real)          # (TB, Dencp)
        hc0 = jnp.dot(mean_f.astype(bf), initw_ref[...],
                      preferred_element_type=f32) + initb_ref[...]            # (TB, 2*Dp)
        h_ref[...] = hc0[:, :dp]
        c_ref[...] = hc0[:, dp:2 * dp]
        # U(features) + (U.bias + W.bias): timestep invariant -> compute once, cache.
        u_ref[...] = (jnp.einsum('bpd,da->bpa', feats, uw_ref[...],
                                 preferred_element_type=f32)
                      + awb_ref[...].reshape(1, 1, -1)).astype(u_ref.dtype)

    h = h_ref[...]                                                            # (TB, Dp)
    c = c_ref[...]

    # ---- attention ----
    w_ah = jnp.dot(h.astype(bf), ww_ref[...], preferred_element_type=f32)     # (TB, Ap)
    if use_bf16_elem:     # bf16 VPU/EUP for the big add+tanh (v6e/v7x only)
        combined = jnp.tanh(u_ref[...] + w_ah[:, None, :].astype(bf))         # (TB, Pp, Ap)
    else:
        combined = jnp.tanh(u_ref[...].astype(f32) + w_ah[:, None, :])
    # score/softmax math stays f32 (av_ref is f32 so the product promotes)
    scores = jnp.sum(combined * av_ref[...].reshape(1, 1, -1), axis=2)        # (TB, Pp) f32
    pix = jax.lax.broadcasted_iota(jnp.int32, scores.shape, 1)
    valid = pix < p_real
    scores = jnp.where(valid, scores, -1e30)
    m = jnp.max(scores, axis=1, keepdims=True)
    e = jnp.where(valid, jnp.exp(scores - m), 0.0)
    alpha = e * pl.reciprocal(jnp.sum(e, axis=1, keepdims=True), approx=True)  # (TB, Pp)
    # context: pixel reduction through the MXU
    context = jnp.einsum('bqp,bpd->bqd', alpha[:, None, :].astype(bf), feats,
                         preferred_element_type=f32)[:, 0, :]                  # (TB, Dencp)

    # ---- LSTMCell (PyTorch gate order i, f, g, o); gate blocks 128-lane aligned ----
    # emb-gate contribution is precomputed outside the recurrence (gemb_ref);
    # the context/hidden contributions are one fused matmul.
    xh = jnp.concatenate([context.astype(bf), h.astype(bf)], axis=1)           # (TB,Dencp+Dp)
    gates = gemb_ref[0, 0] + jnp.dot(xh, wchh_ref[...],
                                     preferred_element_type=f32)               # (TB, 4*Dp)
    i_g = jax.nn.sigmoid(gates[:, 0 * dp:1 * dp])
    f_g = jax.nn.sigmoid(gates[:, 1 * dp:2 * dp])
    g_g = jnp.tanh(gates[:, 2 * dp:3 * dp])
    o_g = jax.nn.sigmoid(gates[:, 3 * dp:4 * dp])
    # Invariant: padded gate lanes stay zero because c0 and all gate pre-activation
    # paddings (initw/initb, wihe/lb, wchh) are exactly zero.
    c_new = f_g * c + i_g * g_g
    h_new = o_g * jnp.tanh(c_new)
    h_ref[...] = h_new
    c_ref[...] = c_new

    # fcn (dropout = identity in eval) is hoisted out: emit the hidden state (bf16).
    hseq_ref[0, 0] = h_new.astype(hseq_ref.dtype)
    alphas_ref[0, 0] = alpha


# ------------------------------ decoder wrapper ------------------------------ #
def decoder_forward(features, captions, kp, cfg):
    # features: (B, P, Dencp) bf16 (pixel axis not yet padded)
    B, P, Dencp = features.shape
    T = captions.shape[1]
    S = T - 1
    V, Ep = kp['emb'].shape            # logical vocab size (rows are not padded)
    Ap = kp['Uw'].shape[1]
    Dp = kp['Ww'].shape[0]
    Pp = round_up(P, LANE)

    nb = cfg['nb'] if B % cfg['nb'] == 0 else 1
    TB = B // nb

    if Pp != P:
        features = jnp.pad(features, ((0, 0), (0, Pp - P), (0, 0)))
    feats = features.reshape(nb, TB, Pp, Dencp)

    # Embedding gather (plain-JAX glue) + hoisted emb-gate matmul (no h/c dependence):
    #   gemb[b, s] = embeds[b, s] @ W_ih_emb + (b_ih + b_hh)
    embeds = jnp.take(kp['emb'], captions[:, :S], axis=0)                 # (B, S, Ep) bf16
    gemb = tiled_matmul_bias(embeds.reshape(B * S, Ep), kp['wihe'], kp['lb'],
                             vmem_limit=cfg['vmem'])                      # (B*S, 4*Dp) f32
    gemb = jnp.transpose(gemb.reshape(nb, TB, S, 4 * Dp), (0, 2, 1, 3))   # (nb,S,TB,4Dp)

    # Loop-invariant operands: whole-array VMEM residency (single-buffered, copied once).
    resident = pl.BlockSpec(memory_space=pltpu.MemorySpace.VMEM)

    in_specs = [
        pl.BlockSpec((1, 1, TB, 4 * Dp), lambda b, s: (b, s, 0, 0)),   # gemb (pipelined)
        resident,                                                       # features
        resident, resident, resident, resident,                         # Uw, Ww, awb, av
        resident, resident, resident,                                   # initw, initb, wchh
    ]
    out_specs = [
        pl.BlockSpec((1, 1, TB, Dp), lambda b, s: (b, s, 0, 0)),
        pl.BlockSpec((1, 1, TB, Pp), lambda b, s: (b, s, 0, 0)),
    ]
    out_shape = [
        jax.ShapeDtypeStruct((nb, S, TB, Dp), jnp.bfloat16),    # hseq in bf16
        jax.ShapeDtypeStruct((nb, S, TB, Pp), jnp.float32),
    ]
    u_dtype = jnp.bfloat16 if cfg['bf16_elem'] else jnp.float32
    scratch = [
        pltpu.VMEM((TB, Dp), jnp.float32),       # h
        pltpu.VMEM((TB, Dp), jnp.float32),       # c
        pltpu.VMEM((TB, Pp, Ap), u_dtype),       # U(features)+bias cache
    ]

    kernel = functools.partial(decoder_step_kernel, p_real=P, dp=Dp,
                               use_bf16_elem=cfg['bf16_elem'])
    hseq, alphas = pl.pallas_call(
        kernel,
        out_shape=out_shape,
        grid_spec=pltpu.PrefetchScalarGridSpec(
            num_scalar_prefetch=0,
            grid=(nb, S),
            in_specs=in_specs,
            out_specs=out_specs,
            scratch_shapes=scratch,
        ),
        compiler_params=pltpu.CompilerParams(
            dimension_semantics=("parallel", "arbitrary"),   # batch parallel, time serial
            vmem_limit_bytes=cfg['vmem']),
    )(gemb, feats, kp['Uw'], kp['Ww'], kp['awb'], kp['av'],
      kp['initw'], kp['initb'], kp['wchh'])

    # Hoisted vocab projection.  Transpose the *small* hidden tensor to batch-major rows
    # before the matmul (no transpose of the big (S*B, Vp) logits afterwards).
    h_rows = jnp.transpose(hseq, (0, 2, 1, 3)).reshape(B * S, Dp)         # bf16 rows
    logits = tiled_matmul_bias(h_rows, kp['fw'], kp['fb'],
                               out_dtype=cfg['logits_dtype'], vmem_limit=cfg['vmem'])
    preds = logits.reshape(B, S, -1)[:, :, :V]
    alphas = jnp.transpose(alphas, (0, 2, 1, 3)).reshape(B, S, Pp)[:, :, :P]
    return preds, alphas


def encoder_decoder_forward(images, captions, kp, cfg):
    features = encoder_forward(images, kp, cfg)
    return decoder_forward(features, captions, kp, cfg)


# ------------------------------ parameters ----------------------------------- #
def init_params(key, *, in_channels, embed_size, vocab_size,
                attention_dim, encoder_dim, decoder_dim):
    """Logical (unpadded, f32) parameters mirroring the PyTorch module layout."""
    ks = jax.random.split(key, 18)
    n = lambda k, shp: (0.05 * jax.random.normal(k, shp)).astype(jnp.float32)
    D = decoder_dim
    return {
        'enc_w': n(ks[0], (in_channels, encoder_dim)),            # stand-in encoder proj
        'emb':   n(ks[1], (vocab_size, embed_size)),
        'Uw': n(ks[2], (encoder_dim, attention_dim)), 'Ub': n(ks[3], (attention_dim,)),
        'Ww': n(ks[4], (decoder_dim, attention_dim)), 'Wb': n(ks[5], (attention_dim,)),
        'Av': n(ks[6], (attention_dim,)),             'Ab': n(ks[7], ()),
        'ihw': n(ks[8], (encoder_dim, D)),  'ihb': n(ks[9], (D,)),
        'icw': n(ks[10], (encoder_dim, D)), 'icb': n(ks[11], (D,)),
        'wihe': n(ks[12], (embed_size, 4 * D)),
        'wihc': n(ks[13], (encoder_dim, 4 * D)),
        'whh':  n(ks[14], (D, 4 * D)),
        'lb':   n(ks[15], (4 * D,)),
        'fw': n(ks[16], (D, vocab_size)), 'fb': n(ks[17], (vocab_size,)),
    }


def pad_to(a, shape):
    return jnp.pad(a, [(0, t - s) for s, t in zip(a.shape, shape)])


def pad_gate_cols(w, d_log, d_pad):
    """Re-lay (..., 4*d_log) so each PyTorch gate (i,f,g,o) starts on a 128-lane boundary."""
    parts = [pad_to(w[..., g * d_log:(g + 1) * d_log], w.shape[:-1] + (d_pad,))
             for g in range(4)]
    return jnp.concatenate(parts, axis=-1)


def pad_params(p):
    """Zero-pad lane dims to multiples of 128 (vocab to 256), cast matmul weights to bf16."""
    Cin, Denc = p['enc_w'].shape
    V, E = p['emb'].shape
    A = p['Uw'].shape[1]
    Ddec = p['ihw'].shape[1]
    Dencp, Ap, Dp, Ep = (round_up(x, LANE) for x in (Denc, A, Ddec, E))
    Vp = round_up(V, 2 * LANE)          # 256-multiple -> vocab matmul always uses tn=256
    bf, f32 = jnp.bfloat16, jnp.float32
    # fused [W_ih_ctx ; W_hh] for the single in-recurrence gate matmul
    wchh = jnp.concatenate(
        [pad_to(pad_gate_cols(p['wihc'], Ddec, Dp), (Dencp, 4 * Dp)),
         pad_to(pad_gate_cols(p['whh'], Ddec, Dp), (Dp, 4 * Dp))], axis=0)
    return {
        'enc_w': pad_to(p['enc_w'], (Cin, Dencp)).astype(bf),
        'enc_b': jnp.zeros((1, Dencp), f32),
        'emb':   pad_to(p['emb'], (V, Ep)).astype(bf),
        'Uw':    pad_to(p['Uw'], (Dencp, Ap)).astype(bf),
        'Ww':    pad_to(p['Ww'], (Dp, Ap)).astype(bf),
        # fold U.bias + W.bias (both added before tanh); A.bias dropped (softmax shift-inv.)
        'awb':   pad_to((p['Ub'] + p['Wb'])[None, :], (1, Ap)).astype(f32),
        'av':    pad_to(p['Av'][None, :], (1, Ap)).astype(f32),
        # fuse init_h / init_c into one matmul
        'initw': jnp.concatenate([pad_to(p['ihw'], (Dencp, Dp)),
                                  pad_to(p['icw'], (Dencp, Dp))], axis=1).astype(bf),
        'initb': jnp.concatenate([pad_to(p['ihb'][None, :], (1, Dp)),
                                  pad_to(p['icb'][None, :], (1, Dp))], axis=1).astype(f32),
        'wihe':  pad_to(pad_gate_cols(p['wihe'], Ddec, Dp), (Ep, 4 * Dp)).astype(bf),
        'lb':    pad_gate_cols(p['lb'], Ddec, Dp)[None, :].astype(f32),
        'wchh':  wchh.astype(bf),
        'fw':    pad_to(p['fw'], (Dp, Vp)).astype(bf),
        'fb':    pad_to(p['fb'][None, :], (1, Vp)).astype(f32),
    }


# ------------------------------ pure-JAX reference --------------------------- #
def reference_forward(images, captions, p):
    """Mirror of the PyTorch forward (eval mode), with bf16 matmul inputs like the kernels."""
    f32, bf = jnp.float32, jnp.bfloat16
    mm = lambda a, b: jnp.dot(a.astype(bf), b.astype(bf), preferred_element_type=f32)
    B, C, H, W = images.shape
    x = jnp.transpose(images, (0, 2, 3, 1)).reshape(B * H * W, C)
    feats = mm(x, p['enc_w']).reshape(B, H * W, -1)
    emb = jnp.take(p['emb'], captions, axis=0)
    mean_f = feats.mean(axis=1)
    h = mm(mean_f, p['ihw']) + p['ihb']
    c = mm(mean_f, p['icw']) + p['icb']
    u = jnp.einsum('bpd,da->bpa', feats.astype(bf), p['Uw'].astype(bf),
                   preferred_element_type=f32) + p['Ub']
    D = p['ihw'].shape[1]
    S = captions.shape[1] - 1
    preds, alphas = [], []
    for s in range(S):
        w_ah = mm(h, p['Ww']) + p['Wb']
        comb = jnp.tanh(u + w_ah[:, None, :])
        scores = jnp.sum(comb * p['Av'][None, None, :], axis=2) + p['Ab']
        alpha = jax.nn.softmax(scores, axis=1)
        context = jnp.einsum('bqp,bpd->bqd', alpha[:, None, :].astype(bf),
                             feats.astype(bf), preferred_element_type=f32)[:, 0]
        gates = (mm(emb[:, s], p['wihe']) + mm(context, p['wihc'])
                 + mm(h, p['whh']) + p['lb'])
        i_g = jax.nn.sigmoid(gates[:, :D]);        f_g = jax.nn.sigmoid(gates[:, D:2 * D])
        g_g = jnp.tanh(gates[:, 2 * D:3 * D]);     o_g = jax.nn.sigmoid(gates[:, 3 * D:4 * D])
        c = f_g * c + i_g * g_g
        h = o_g * jnp.tanh(c)
        preds.append(mm(h, p['fw']) + p['fb'])
        alphas.append(alpha)
    return jnp.stack(preds, axis=1), jnp.stack(alphas, axis=1)


# ----------------------------------- main ------------------------------------ #
if __name__ == "__main__":
    B, Cin, H, W = 2, 3, 8, 8
    embed_size, vocab_size = 16, 100
    attention_dim, encoder_dim, decoder_dim = 32, 32, 32
    T = 9  # caption length -> seq_length = 8

    key = jax.random.PRNGKey(0)
    k_img, k_cap, k_par = jax.random.split(key, 3)
    images = jax.random.normal(k_img, (B, Cin, H, W), dtype=jnp.float32)
    captions = jax.random.randint(k_cap, (B, T), 0, vocab_size, dtype=jnp.int32)
    logical = init_params(
        k_par, in_channels=Cin, embed_size=embed_size, vocab_size=vocab_size,
        attention_dim=attention_dim, encoder_dim=encoder_dim, decoder_dim=decoder_dim)
    kparams = pad_params(logical)
    cfg = make_config(B)

    fwd = jax.jit(functools.partial(encoder_decoder_forward, cfg=cfg))
    preds, alphas = fwd(images, captions, kparams)
    jax.block_until_ready((preds, alphas))

    assert preds.shape == (B, T - 1, vocab_size), preds.shape
    assert alphas.shape == (B, T - 1, H * W), alphas.shape
    assert bool(jnp.all(jnp.isfinite(preds))) and bool(jnp.all(jnp.isfinite(alphas)))
    # approx reciprocal in the softmax normalization -> allow a small sum tolerance
    assert bool(jnp.allclose(jnp.sum(alphas, axis=-1), 1.0, atol=2e-3))

    ref_preds, ref_alphas = reference_forward(images, captions, logical)
    assert bool(jnp.allclose(preds.astype(jnp.float32), ref_preds, atol=1e-2)), \
        float(jnp.max(jnp.abs(preds.astype(jnp.float32) - ref_preds)))
    assert bool(jnp.allclose(alphas, ref_alphas, atol=1e-2)), \
        float(jnp.max(jnp.abs(alphas - ref_alphas)))

    print("KERNEL_OK")
</pallas_src>

<mosaic_0001>
module attributes {stable_mosaic.version = 11 : i64} {
  func.func @matmul_bias_kernel(%arg0: i32, %arg1: i32, %arg2: i32, %arg3: memref<16x128xbf16, #tpu.memory_space<vmem>>, %arg4: memref<128x256xbf16, #tpu.memory_space<vmem>>, %arg5: memref<1x256xf32, #tpu.memory_space<vmem>>, %arg6: memref<16x256xf32, #tpu.memory_space<vmem>>, %arg7: memref<16x256xf32, #tpu.memory_space<vmem>>) attributes {dimension_semantics = [#tpu.dimension_semantics<parallel>, #tpu.dimension_semantics<parallel>, #tpu.dimension_semantics<arbitrary>], iteration_bounds = array<i64: 1, 2, 1>, scalar_prefetch = 0 : i64, scratch_operands = 1 : i64, tpu.core_type = #tpu.core_type<tc>, window_params = [{transform_indices = @transform_0, window_bounds = array<i64: 16, 128>}, {transform_indices = @transform_1, window_bounds = array<i64: 128, 256>}, {transform_indices = @transform_2, window_bounds = array<i64: 1, 256>}, {transform_indices = @transform_3, window_bounds = array<i64: 16, 256>}]} {
    %c0_i32 = arith.constant 0 : i32
    %0 = arith.cmpi eq, %arg2, %c0_i32 : i32
    %1 = arith.extui %0 : i1 to i32
    %c0_i32_0 = arith.constant 0 : i32
    %2 = arith.cmpi ne, %1, %c0_i32_0 : i32
    scf.if %2 {
      %cst_10 = arith.constant 0.000000e+00 : f32
      %12 = vector.broadcast %cst_10 : f32 to vector<16x256xf32>
      %c0_11 = arith.constant 0 : index
      %c0_12 = arith.constant 0 : index
      %13 = vector.load %arg7[%c0_11, %c0_12] : memref<16x256xf32, #tpu.memory_space<vmem>>, vector<16x256xf32>
      tpu.vector_store %arg7[%c0_11, %c0_12], %12 {strides = array<i32>} : memref<16x256xf32, #tpu.memory_space<vmem>>, vector<16x256xf32>,
    } else {
    }
    %c0 = arith.constant 0 : index
    %c0_1 = arith.constant 0 : index
    %3 = vector.load %arg7[%c0, %c0_1] : memref<16x256xf32, #tpu.memory_space<vmem>>, vector<16x256xf32>
    %c0_2 = arith.constant 0 : index
    %c0_3 = arith.constant 0 : index
    %4 = vector.load %arg3[%c0_2, %c0_3] : memref<16x128xbf16, #tpu.memory_space<vmem>>, vector<16x128xbf16>
    %c0_4 = arith.constant 0 : index
    %c0_5 = arith.constant 0 : index
    %5 = vector.load %arg4[%c0_4, %c0_5] : memref<128x256xbf16, #tpu.memory_space<vmem>>, vector<128x256xbf16>
    %cst = arith.constant dense<0.000000e+00> : vector<16x256xf32>
    %6 = tpu.matmul %4, %5, %cst {dimension_numbers = #tpu.dot_dimension_numbers<[1], [0], [0], [1], [0, 0, 1, 1], [], []>} : vector<16x128xbf16>, vector<128x256xbf16>, vector<16x256xf32> -> vector<16x256xf32>
    %7 = arith.addf %3, %6 : vector<16x256xf32>
    %c0_6 = arith.constant 0 : index
    %c0_7 = arith.constant 0 : index
    %8 = vector.load %arg7[%c0_6, %c0_7] : memref<16x256xf32, #tpu.memory_space<vmem>>, vector<16x256xf32>
    tpu.vector_store %arg7[%c0_6, %c0_7], %7 {strides = array<i32>} : memref<16x256xf32, #tpu.memory_space<vmem>>, vector<16x256xf32>,
    %c0_i32_8 = arith.constant 0 : i32
    %9 = arith.cmpi eq, %arg2, %c0_i32_8 : i32
    %10 = arith.extui %9 : i1 to i32
    %c0_i32_9 = arith.constant 0 : i32
    %11 = arith.cmpi ne, %10, %c0_i32_9 : i32
    scf.if %11 {
      %c0_10 = arith.constant 0 : index
      %c0_11 = arith.constant 0 : index
      %12 = vector.load %arg7[%c0_10, %c0_11] : memref<16x256xf32, #tpu.memory_space<vmem>>, vector<16x256xf32>
      %c0_12 = arith.constant 0 : index
      %c0_13 = arith.constant 0 : index
      %13 = vector.load %arg5[%c0_12, %c0_13] : memref<1x256xf32, #tpu.memory_space<vmem>>, vector<1x256xf32>
      %14 = vector.broadcast %13 : vector<1x256xf32> to vector<16x256xf32>
      %15 = arith.addf %12, %14 : vector<16x256xf32>
      %c0_14 = arith.constant 0 : index
      %c0_15 = arith.constant 0 : index
      %16 = vector.load %arg6[%c0_14, %c0_15] : memref<16x256xf32, #tpu.memory_space<vmem>>, vector<16x256xf32>
      tpu.vector_store %arg6[%c0_14, %c0_15], %15 {strides = array<i32>} : memref<16x256xf32, #tpu.memory_space<vmem>>, vector<16x256xf32>,
    } else {
    }
    return
  }
  func.func @transform_0(%arg0: i32, %arg1: i32, %arg2: i32) -> (i32, i32) {
    %c0_i32 = arith.constant 0 : i32
    return %arg0, %arg2 : i32, i32
  }
  func.func @transform_1(%arg0: i32, %arg1: i32, %arg2: i32) -> (i32, i32) {
    %c0_i32 = arith.constant 0 : i32
    return %arg2, %arg1 : i32, i32
  }
  func.func @transform_2(%arg0: i32, %arg1: i32, %arg2: i32) -> (i32, i32) {
    %c0_i32 = arith.constant 0 : i32
    %c0_i32_0 = arith.constant 0 : i32
    return %c0_i32, %arg1 : i32, i32
  }
  func.func @transform_3(%arg0: i32, %arg1: i32, %arg2: i32) -> (i32, i32) {
    %c0_i32 = arith.constant 0 : i32
    return %arg0, %arg1 : i32, i32
  }
}

module attributes {stable_mosaic.version = 11 : i64} {
  func.func @matmul_bias_kernel(%arg0: i32, %arg1: i32, %arg2: i32, %arg3: memref<128x3xbf16, #tpu.memory_space<vmem>>, %arg4: memref<3x128xbf16, #tpu.memory_space<vmem>>, %arg5: memref<1x128xf32, #tpu.memory_space<vmem>>, %arg6: memref<128x128xbf16, #tpu.memory_space<vmem>>, %arg7: memref<128x128xf32, #tpu.memory_space<vmem>>) attributes {dimension_semantics = [#tpu.dimension_semantics<parallel>, #tpu.dimension_semantics<parallel>, #tpu.dimension_semantics<arbitrary>], iteration_bounds = array<i64: 1, 1, 1>, scalar_prefetch = 0 : i64, scratch_operands = 1 : i64, tpu.core_type = #tpu.core_type<tc>, window_params = [{transform_indices = @transform_0, window_bounds = array<i64: 128, 3>}, {transform_indices = @transform_1, window_bounds = array<i64: 3, 128>}, {transform_indices = @transform_2, window_bounds = array<i64: 1, 128>}, {transform_indices = @transform_3, window_bounds = array<i64: 128, 128>}]} {
    %c0_i32 = arith.constant 0 : i32
    %0 = arith.cmpi eq, %arg2, %c0_i32 : i32
    %1 = arith.extui %0 : i1 to i32
    %c0_i32_0 = arith.constant 0 : i32
    %2 = arith.cmpi ne, %1, %c0_i32_0 : i32
    scf.if %2 {
      %cst_10 = arith.constant 0.000000e+00 : f32
      %12 = vector.broadcast %cst_10 : f32 to vector<128x128xf32>
      %c0_11 = arith.constant 0 : index
      %c0_12 = arith.constant 0 : index
      %13 = vector.load %arg7[%c0_11, %c0_12] : memref<128x128xf32, #tpu.memory_space<vmem>>, vector<128x128xf32>
      tpu.vector_store %arg7[%c0_11, %c0_12], %12 {strides = array<i32>} : memref<128x128xf32, #tpu.memory_space<vmem>>, vector<128x128xf32>,
    } else {
    }
    %c0 = arith.constant 0 : index
    %c0_1 = arith.constant 0 : index
    %3 = vector.load %arg7[%c0, %c0_1] : memref<128x128xf32, #tpu.memory_space<vmem>>, vector<128x128xf32>
    %c0_2 = arith.constant 0 : index
    %c0_3 = arith.constant 0 : index
    %4 = vector.load %arg3[%c0_2, %c0_3] : memref<128x3xbf16, #tpu.memory_space<vmem>>, vector<128x3xbf16>
    %c0_4 = arith.constant 0 : index
    %c0_5 = arith.constant 0 : index
    %5 = vector.load %arg4[%c0_4, %c0_5] : memref<3x128xbf16, #tpu.memory_space<vmem>>, vector<3x128xbf16>
    %cst = arith.constant dense<0.000000e+00> : vector<128x128xf32>
    %6 = tpu.matmul %4, %5, %cst {dimension_numbers = #tpu.dot_dimension_numbers<[1], [0], [0], [1], [0, 0, 1, 1], [], []>} : vector<128x3xbf16>, vector<3x128xbf16>, vector<128x128xf32> -> vector<128x128xf32>
    %7 = arith.addf %3, %6 : vector<128x128xf32>
    %c0_6 = arith.constant 0 : index
    %c0_7 = arith.constant 0 : index
    %8 = vector.load %arg7[%c0_6, %c0_7] : memref<128x128xf32, #tpu.memory_space<vmem>>, vector<128x128xf32>
    tpu.vector_store %arg7[%c0_6, %c0_7], %7 {strides = array<i32>} : memref<128x128xf32, #tpu.memory_space<vmem>>, vector<128x128xf32>,
    %c0_i32_8 = arith.constant 0 : i32
    %9 = arith.cmpi eq, %arg2, %c0_i32_8 : i32
    %10 = arith.extui %9 : i1 to i32
    %c0_i32_9 = arith.constant 0 : i32
    %11 = arith.cmpi ne, %10, %c0_i32_9 : i32
    scf.if %11 {
      %c0_10 = arith.constant 0 : index
      %c0_11 = arith.constant 0 : index
      %12 = vector.load %arg7[%c0_10, %c0_11] : memref<128x128xf32, #tpu.memory_space<vmem>>, vector<128x128xf32>
      %c0_12 = arith.constant 0 : index
      %c0_13 = arith.constant 0 : index
      %13 = vector.load %arg5[%c0_12, %c0_13] : memref<1x128xf32, #tpu.memory_space<vmem>>, vector<1x128xf32>
      %14 = vector.broadcast %13 : vector<1x128xf32> to vector<128x128xf32>
      %15 = arith.addf %12, %14 : vector<128x128xf32>
      %16 = arith.truncf %15 : vector<128x128xf32> to vector<128x128xbf16>
      %c0_14 = arith.constant 0 : index
      %c0_15 = arith.constant 0 : index
      %17 = vector.load %arg6[%c0_14, %c0_15] : memref<128x128xbf16, #tpu.memory_space<vmem>>, vector<128x128xbf16>
      tpu.vector_store %arg6[%c0_14, %c0_15], %16 {strides = array<i32>} : memref<128x128xbf16, #tpu.memory_space<vmem>>, vector<128x128xbf16>,
    } else {
    }
    return
  }
  func.func @transform_0(%arg0: i32, %arg1: i32, %arg2: i32) -> (i32, i32) {
    %c0_i32 = arith.constant 0 : i32
    return %arg0, %arg2 : i32, i32
  }
  func.func @transform_1(%arg0: i32, %arg1: i32, %arg2: i32) -> (i32, i32) {
    %c0_i32 = arith.constant 0 : i32
    return %arg2, %arg1 : i32, i32
  }
  func.func @transform_2(%arg0: i32, %arg1: i32, %arg2: i32) -> (i32, i32) {
    %c0_i32 = arith.constant 0 : i32
    %c0_i32_0 = arith.constant 0 : i32
    return %c0_i32, %arg1 : i32, i32
  }
  func.func @transform_3(%arg0: i32, %arg1: i32, %arg2: i32) -> (i32, i32) {
    %c0_i32 = arith.constant 0 : i32
    return %arg0, %arg1 : i32, i32
  }
}

module attributes {stable_mosaic.version = 11 : i64} {
  func.func @decoder_step_kernel(%arg0: i32, %arg1: i32, %arg2: memref<1x1x2x512xf32, #tpu.memory_space<vmem>>, %arg3: memref<1x2x128x128xbf16, #tpu.memory_space<vmem>>, %arg4: memref<128x128xbf16, #tpu.memory_space<vmem>>, %arg5: memref<128x128xbf16, #tpu.memory_space<vmem>>, %arg6: memref<1x128xf32, #tpu.memory_space<vmem>>, %arg7: memref<1x128xf32, #tpu.memory_space<vmem>>, %arg8: memref<128x256xbf16, #tpu.memory_space<vmem>>, %arg9: memref<1x256xf32, #tpu.memory_space<vmem>>, %arg10: memref<256x512xbf16, #tpu.memory_space<vmem>>, %arg11: memref<1x1x2x128xbf16, #tpu.memory_space<vmem>>, %arg12: memref<1x1x2x128xf32, #tpu.memory_space<vmem>>, %arg13: memref<2x128xf32, #tpu.memory_space<vmem>>, %arg14: memref<2x128xf32, #tpu.memory_space<vmem>>, %arg15: memref<2x128x128xf32, #tpu.memory_space<vmem>>) attributes {dimension_semantics = [#tpu.dimension_semantics<parallel>, #tpu.dimension_semantics<arbitrary>], iteration_bounds = array<i64: 1, 8>, scalar_prefetch = 0 : i64, scratch_operands = 3 : i64, tpu.core_type = #tpu.core_type<tc>, window_params = [{transform_indices = @transform_0, window_bounds = array<i64: 1, 1, 2, 512>}, {pipeline_mode = #tpu.pipeline_mode<synchronous>, transform_indices = @transform_1, window_bounds = array<i64: 1, 2, 128, 128>}, {pipeline_mode = #tpu.pipeline_mode<synchronous>, transform_indices = @transform_2, window_bounds = array<i64: 128, 128>}, {pipeline_mode = #tpu.pipeline_mode<synchronous>, transform_indices = @transform_3, window_bounds = array<i64: 128, 128>}, {pipeline_mode = #tpu.pipeline_mode<synchronous>, transform_indices = @transform_4, window_bounds = array<i64: 1, 128>}, {pipeline_mode = #tpu.pipeline_mode<synchronous>, transform_indices = @transform_5, window_bounds = array<i64: 1, 128>}, {pipeline_mode = #tpu.pipeline_mode<synchronous>, transform_indices = @transform_6, window_bounds = array<i64: 128, 256>}, {pipeline_mode = #tpu.pipeline_mode<synchronous>, transform_indices = @transform_7, window_bounds = array<i64: 1, 256>}, {pipeline_mode = #tpu.pipeline_mode<synchronous>, transform_indices = @transform_8, window_bounds = array<i64: 256, 512>}, {transform_indices = @transform_9, window_bounds = array<i64: 1, 1, 2, 128>}, {transform_indices = @transform_10, window_bounds = array<i64: 1, 1, 2, 128>}]} {
    %0 = arith.index_cast %arg0 : i32 to index
    %c0 = arith.constant 0 : index
    %c0_0 = arith.constant 0 : index
    %c0_1 = arith.constant 0 : index
    %1 = vector.load %arg3[%0, %c0, %c0_0, %c0_1] : memref<1x2x128x128xbf16, #tpu.memory_space<vmem>>, vector<1x2x128x128xbf16>
    %2 = vector.shape_cast %1 : vector<1x2x128x128xbf16> to vector<2x128x128xbf16>
    %c0_i32 = arith.constant 0 : i32
    %3 = arith.cmpi eq, %arg1, %c0_i32 : i32
    %4 = arith.extui %3 : i1 to i32
    %c0_i32_2 = arith.constant 0 : i32
    %5 = arith.cmpi ne, %4, %c0_i32_2 : i32
    scf.if %5 {
      %84 = arith.extf %2 : vector<2x128x128xbf16> to vector<2x128x128xf32>
      %cst_42 = arith.constant dense<0.000000e+00> : vector<2x128xf32>
      %85 = vector.multi_reduction <add>, %84, %cst_42 [1] : vector<2x128x128xf32> to vector<2x128xf32>
      %cst_43 = arith.constant 1.562500e-02 : f32
      %86 = vector.broadcast %cst_43 : f32 to vector<2x128xf32>
      %87 = arith.mulf %85, %86 : vector<2x128xf32>
      %88 = arith.truncf %87 : vector<2x128xf32> to vector<2x128xbf16>
      %c0_44 = arith.constant 0 : index
      %c0_45 = arith.constant 0 : index
      %89 = vector.load %arg8[%c0_44, %c0_45] : memref<128x256xbf16, #tpu.memory_space<vmem>>, vector<128x256xbf16>
      %cst_46 = arith.constant dense<0.000000e+00> : vector<2x256xf32>
      %90 = tpu.matmul %88, %89, %cst_46 {dimension_numbers = #tpu.dot_dimension_numbers<[1], [0], [0], [1], [0, 0, 1, 1], [], []>} : vector<2x128xbf16>, vector<128x256xbf16>, vector<2x256xf32> -> vector<2x256xf32>
      %c0_47 = arith.constant 0 : index
      %c0_48 = arith.constant 0 : index
      %91 = vector.load %arg9[%c0_47, %c0_48] : memref<1x256xf32, #tpu.memory_space<vmem>>, vector<1x256xf32>
      %92 = vector.broadcast %91 : vector<1x256xf32> to vector<2x256xf32>
      %93 = arith.addf %90, %92 : vector<2x256xf32>
      %94 = vector.extract_strided_slice %93 {offsets = [0, 0], sizes = [2, 128], strides = [1, 1]} : vector<2x256xf32> to vector<2x128xf32>
      %c0_49 = arith.constant 0 : index
      %c0_50 = arith.constant 0 : index
      %95 = vector.load %arg13[%c0_49, %c0_50] : memref<2x128xf32, #tpu.memory_space<vmem>>, vector<2x128xf32>
      tpu.vector_store %arg13[%c0_49, %c0_50], %94 {strides = array<i32>} : memref<2x128xf32, #tpu.memory_space<vmem>>, vector<2x128xf32>,
      %96 = vector.extract_strided_slice %93 {offsets = [0, 128], sizes = [2, 128], strides = [1, 1]} : vector<2x256xf32> to vector<2x128xf32>
      %c0_51 = arith.constant 0 : index
      %c0_52 = arith.constant 0 : index
      %97 = vector.load %arg14[%c0_51, %c0_52] : memref<2x128xf32, #tpu.memory_space<vmem>>, vector<2x128xf32>
      tpu.vector_store %arg14[%c0_51, %c0_52], %96 {strides = array<i32>} : memref<2x128xf32, #tpu.memory_space<vmem>>, vector<2x128xf32>,
      %c0_53 = arith.constant 0 : index
      %c0_54 = arith.constant 0 : index
      %98 = vector.load %arg4[%c0_53, %c0_54] : memref<128x128xbf16, #tpu.memory_space<vmem>>, vector<128x128xbf16>
      "tpu.trace_start"() <{level = 10 : i32, message = "bpd,da->bpa"}> : () -> ()
      %cst_55 = arith.constant dense<0.000000e+00> : vector<2x128x128xf32>
      %99 = tpu.matmul %2, %98, %cst_55 {dimension_numbers = #tpu.dot_dimension_numbers<[2], [0], [0, 1], [1], [0, 0, 0, 1, 1, 1], [], []>} : vector<2x128x128xbf16>, vector<128x128xbf16>, vector<2x128x128xf32> -> vector<2x128x128xf32>
      "tpu.trace_stop"() : () -> ()
      %c0_56 = arith.constant 0 : index
      %c0_57 = arith.constant 0 : index
      %100 = vector.load %arg6[%c0_56, %c0_57] : memref<1x128xf32, #tpu.memory_space<vmem>>, vector<1x128xf32>
      %101 = vector.shape_cast %100 : vector<1x128xf32> to vector<1x1x128xf32>
      %102 = vector.broadcast %101 : vector<1x1x128xf32> to vector<2x128x128xf32>
      %103 = arith.addf %99, %102 : vector<2x128x128xf32>
      %c0_58 = arith.constant 0 : index
      %c0_59 = arith.constant 0 : index
      %c0_60 = arith.constant 0 : index
      %104 = vector.load %arg15[%c0_58, %c0_59, %c0_60] : memref<2x128x128xf32, #tpu.memory_space<vmem>>, vector<2x128x128xf32>
      tpu.vector_store %arg15[%c0_58, %c0_59, %c0_60], %103 {strides = array<i32>} : memref<2x128x128xf32, #tpu.memory_space<vmem>>, vector<2x128x128xf32>,
    } else {
    }
    %c0_3 = arith.constant 0 : index
    %c0_4 = arith.constant 0 : index
    %6 = vector.load %arg13[%c0_3, %c0_4] : memref<2x128xf32, #tpu.memory_space<vmem>>, vector<2x128xf32>
    %c0_5 = arith.constant 0 : index
    %c0_6 = arith.constant 0 : index
    %7 = vector.load %arg14[%c0_5, %c0_6] : memref<2x128xf32, #tpu.memory_space<vmem>>, vector<2x128xf32>
    %8 = arith.truncf %6 : vector<2x128xf32> to vector<2x128xbf16>
    %c0_7 = arith.constant 0 : index
    %c0_8 = arith.constant 0 : index
    %9 = vector.load %arg5[%c0_7, %c0_8] : memref<128x128xbf16, #tpu.memory_space<vmem>>, vector<128x128xbf16>
    %cst = arith.constant dense<0.000000e+00> : vector<2x128xf32>
    %10 = tpu.matmul %8, %9, %cst {dimension_numbers = #tpu.dot_dimension_numbers<[1], [0], [0], [1], [0, 0, 1, 1], [], []>} : vector<2x128xbf16>, vector<128x128xbf16>, vector<2x128xf32> -> vector<2x128xf32>
    %c0_9 = arith.constant 0 : index
    %c0_10 = arith.constant 0 : index
    %c0_11 = arith.constant 0 : index
    %11 = vector.load %arg15[%c0_9, %c0_10, %c0_11] : memref<2x128x128xf32, #tpu.memory_space<vmem>>, vector<2x128x128xf32>
    %12 = vector.shape_cast %10 : vector<2x128xf32> to vector<2x1x128xf32>
    %13 = vector.broadcast %12 : vector<2x1x128xf32> to vector<2x128x128xf32>
    %14 = arith.addf %11, %13 : vector<2x128x128xf32>
    %15 = math.tanh %14 : vector<2x128x128xf32>
    %c0_12 = arith.constant 0 : index
    %c0_13 = arith.constant 0 : index
    %16 = vector.load %arg7[%c0_12, %c0_13] : memref<1x128xf32, #tpu.memory_space<vmem>>, vector<1x128xf32>
    %17 = vector.shape_cast %16 : vector<1x128xf32> to vector<1x1x128xf32>
    %18 = vector.broadcast %17 : vector<1x1x128xf32> to vector<2x128x128xf32>
    %19 = arith.mulf %15, %18 : vector<2x128x128xf32>
    %cst_14 = arith.constant dense<0.000000e+00> : vector<2x128xf32>
    %20 = vector.multi_reduction <add>, %19, %cst_14 [2] : vector<2x128x128xf32> to vector<2x128xf32>
    %21 = tpu.iota {dimensions = array<i32: 1>} : vector<2x128xi32>
    %c64_i32 = arith.constant 64 : i32
    %22 = vector.broadcast %c64_i32 : i32 to vector<2x128xi32>
    %23 = arith.cmpi slt, %21, %22 : vector<2x128xi32>
    %cst_15 = arith.constant -1.000000e+30 : f32
    %24 = vector.broadcast %cst_15 : f32 to vector<2x128xf32>
    %25 = arith.select %23, %20, %24 : vector<2x128xi1>, vector<2x128xf32>
    %cst_16 = arith.constant dense<0xFF800000> : vector<2xf32>
    %26 = vector.multi_reduction <maximumf>, %25, %cst_16 [1] : vector<2x128xf32> to vector<2xf32>
    %27 = vector.shape_cast %26 : vector<2xf32> to vector<2x1xf32>
    %28 = vector.broadcast %27 : vector<2x1xf32> to vector<2x128xf32>
    %29 = arith.subf %25, %28 : vector<2x128xf32>
    %30 = math.exp %29 : vector<2x128xf32>
    %cst_17 = arith.constant 0.000000e+00 : f32
    %31 = vector.broadcast %cst_17 : f32 to vector<2x128xf32>
    %32 = arith.select %23, %30, %31 : vector<2x128xi1>, vector<2x128xf32>
    %cst_18 = arith.constant dense<0.000000e+00> : vector<2xf32>
    %33 = vector.multi_reduction <add>, %32, %cst_18 [1] : vector<2x128xf32> to vector<2xf32>
    %34 = vector.shape_cast %33 : vector<2xf32> to vector<2x1xf32>
    %35 = tpu.reciprocal %34 {approx = true} : vector<2x1xf32> -> vector<2x1xf32>
    %36 = vector.broadcast %35 : vector<2x1xf32> to vector<2x128xf32>
    %37 = arith.mulf %32, %36 : vector<2x128xf32>
    %38 = vector.shape_cast %37 : vector<2x128xf32> to vector<2x1x128xf32>
    %39 = arith.truncf %38 : vector<2x1x128xf32> to vector<2x1x128xbf16>
    "tpu.trace_start"() <{level = 10 : i32, message = "bqp,bpd->bqd"}> : () -> ()
    %cst_19 = arith.constant dense<0.000000e+00> : vector<2x1x128xf32>
    %40 = tpu.matmul %39, %2, %cst_19 {dimension_numbers = #tpu.dot_dimension_numbers<[2], [1], [1], [2], [0, 0, 0, 1, 1, 2], [0], [0]>} : vector<2x1x128xbf16>, vector<2x128x128xbf16>, vector<2x1x128xf32> -> vector<2x1x128xf32>
    "tpu.trace_stop"() : () -> ()
    %41 = vector.shape_cast %40 : vector<2x1x128xf32> to vector<2x128xf32>
    %42 = arith.truncf %41 : vector<2x128xf32> to vector<2x128xbf16>
    %43 = arith.truncf %6 : vector<2x128xf32> to vector<2x128xbf16>
    %44 = tpu.concatenate %42, %43 in 1 : vector<2x128xbf16>, vector<2x128xbf16> -> vector<2x256xbf16>
    %c0_20 = arith.constant 0 : index
    %c0_21 = arith.constant 0 : index
    %c0_22 = arith.constant 0 : index
    %c0_23 = arith.constant 0 : index
    %45 = vector.load %arg2[%c0_20, %c0_21, %c0_22, %c0_23] : memref<1x1x2x512xf32, #tpu.memory_space<vmem>>, vector<1x1x2x512xf32>
    %46 = vector.shape_cast %45 : vector<1x1x2x512xf32> to vector<2x512xf32>
    %c0_24 = arith.constant 0 : index
    %c0_25 = arith.constant 0 : index
    %47 = vector.load %arg10[%c0_24, %c0_25] : memref<256x512xbf16, #tpu.memory_space<vmem>>, vector<256x512xbf16>
    %cst_26 = arith.constant dense<0.000000e+00> : vector<2x512xf32>
    %48 = tpu.matmul %44, %47, %cst_26 {dimension_numbers = #tpu.dot_dimension_numbers<[1], [0], [0], [1], [0, 0, 1, 1], [], []>} : vector<2x256xbf16>, vector<256x512xbf16>, vector<2x512xf32> -> vector<2x512xf32>
    %49 = arith.addf %46, %48 : vector<2x512xf32>
    %50 = vector.extract_strided_slice %49 {offsets = [0, 0], sizes = [2, 128], strides = [1, 1]} : vector<2x512xf32> to vector<2x128xf32>
    %51 = arith.negf %50 : vector<2x128xf32>
    %52 = math.exp %51 : vector<2x128xf32>
    %cst_27 = arith.constant 1.000000e+00 : f32
    %53 = vector.broadcast %cst_27 : f32 to vector<2x128xf32>
    %54 = arith.addf %53, %52 : vector<2x128xf32>
    %55 = arith.divf %53, %54 : vector<2x128xf32>
    %56 = vector.extract_strided_slice %49 {offsets = [0, 128], sizes = [2, 128], strides = [1, 1]} : vector<2x512xf32> to vector<2x128xf32>
    %57 = arith.negf %56 : vector<2x128xf32>
    %58 = math.exp %57 : vector<2x128xf32>
    %cst_28 = arith.constant 1.000000e+00 : f32
    %59 = vector.broadcast %cst_28 : f32 to vector<2x128xf32>
    %60 = arith.addf %59, %58 : vector<2x128xf32>
    %61 = arith.divf %59, %60 : vector<2x128xf32>
    %62 = vector.extract_strided_slice %49 {offsets = [0, 256], sizes = [2, 128], strides = [1, 1]} : vector<2x512xf32> to vector<2x128xf32>
    %63 = math.tanh %62 : vector<2x128xf32>
    %64 = vector.extract_strided_slice %49 {offsets = [0, 384], sizes = [2, 128], strides = [1, 1]} : vector<2x512xf32> to vector<2x128xf32>
    %65 = arith.negf %64 : vector<2x128xf32>
    %66 = math.exp %65 : vector<2x128xf32>
    %cst_29 = arith.constant 1.000000e+00 : f32
    %67 = vector.broadcast %cst_29 : f32 to vector<2x128xf32>
    %68 = arith.addf %67, %66 : vector<2x128xf32>
    %69 = arith.divf %67, %68 : vector<2x128xf32>
    %70 = arith.mulf %61, %7 : vector<2x128xf32>
    %71 = arith.mulf %55, %63 : vector<2x128xf32>
    %72 = arith.addf %70, %71 : vector<2x128xf32>
    %73 = math.tanh %72 : vector<2x128xf32>
    %74 = arith.mulf %69, %73 : vector<2x128xf32>
    %c0_30 = arith.constant 0 : index
    %c0_31 = arith.constant 0 : index
    %75 = vector.load %arg13[%c0_30, %c0_31] : memref<2x128xf32, #tpu.memory_space<vmem>>, vector<2x128xf32>
    tpu.vector_store %arg13[%c0_30, %c0_31], %74 {strides = array<i32>} : memref<2x128xf32, #tpu.memory_space<vmem>>, vector<2x128xf32>,
    %c0_32 = arith.constant 0 : index
    %c0_33 = arith.constant 0 : index
    %76 = vector.load %arg14[%c0_32, %c0_33] : memref<2x128xf32, #tpu.memory_space<vmem>>, vector<2x128xf32>
    tpu.vector_store %arg14[%c0_32, %c0_33], %72 {strides = array<i32>} : memref<2x128xf32, #tpu.memory_space<vmem>>, vector<2x128xf32>,
    %77 = arith.truncf %74 : vector<2x128xf32> to vector<2x128xbf16>
    %c0_34 = arith.constant 0 : index
    %c0_35 = arith.constant 0 : index
    %c0_36 = arith.constant 0 : index
    %c0_37 = arith.constant 0 : index
    %78 = vector.load %arg11[%c0_34, %c0_35, %c0_36, %c0_37] : memref<1x1x2x128xbf16, #tpu.memory_space<vmem>>, vector<1x1x2x128xbf16>
    %79 = vector.shape_cast %78 : vector<1x1x2x128xbf16> to vector<2x128xbf16>
    %80 = vector.shape_cast %77 : vector<2x128xbf16> to vector<1x1x2x128xbf16>
    tpu.vector_store %arg11[%c0_34, %c0_35, %c0_36, %c0_37], %80 {strides = array<i32>} : memref<1x1x2x128xbf16, #tpu.memory_space<vmem>>, vector<1x1x2x128xbf16>,
    %c0_38 = arith.constant 0 : index
    %c0_39 = arith.constant 0 : index
    %c0_40 = arith.constant 0 : index
    %c0_41 = arith.constant 0 : index
    %81 = vector.load %arg12[%c0_38, %c0_39, %c0_40, %c0_41] : memref<1x1x2x128xf32, #tpu.memory_space<vmem>>, vector<1x1x2x128xf32>
    %82 = vector.shape_cast %81 : vector<1x1x2x128xf32> to vector<2x128xf32>
    %83 = vector.shape_cast %37 : vector<2x128xf32> to vector<1x1x2x128xf32>
    tpu.vector_store %arg12[%c0_38, %c0_39, %c0_40, %c0_41], %83 {strides = array<i32>} : memref<1x1x2x128xf32, #tpu.memory_space<vmem>>, vector<1x1x2x128xf32>,
    return
  }
  func.func @transform_0(%arg0: i32, %arg1: i32) -> (i32, i32, i32, i32) {
    %c0_i32 = arith.constant 0 : i32
    %c0_i32_0 = arith.constant 0 : i32
    %c0_i32_1 = arith.constant 0 : i32
    return %arg0, %arg1, %c0_i32, %c0_i32_0 : i32, i32, i32, i32
  }
  func.func @transform_1(%arg0: i32, %arg1: i32) -> (i32, i32, i32, i32) {
    %c0_i32 = arith.constant 0 : i32
    %c0_i32_0 = arith.constant 0 : i32
    %c0_i32_1 = arith.constant 0 : i32
    %c0_i32_2 = arith.constant 0 : i32
    %c0_i32_3 = arith.constant 0 : i32
    return %c0_i32, %c0_i32_0, %c0_i32_1, %c0_i32_2 : i32, i32, i32, i32
  }
  func.func @transform_2(%arg0: i32, %arg1: i32) -> (i32, i32) {
    %c0_i32 = arith.constant 0 : i32
    %c0_i32_0 = arith.constant 0 : i32
    %c0_i32_1 = arith.constant 0 : i32
    return %c0_i32, %c0_i32_0 : i32, i32
  }
  func.func @transform_3(%arg0: i32, %arg1: i32) -> (i32, i32) {
    %c0_i32 = arith.constant 0 : i32
    %c0_i32_0 = arith.constant 0 : i32
    %c0_i32_1 = arith.constant 0 : i32
    return %c0_i32, %c0_i32_0 : i32, i32
  }
  func.func @transform_4(%arg0: i32, %arg1: i32) -> (i32, i32) {
    %c0_i32 = arith.constant 0 : i32
    %c0_i32_0 = arith.constant 0 : i32
    %c0_i32_1 = arith.constant 0 : i32
    return %c0_i32, %c0_i32_0 : i32, i32
  }
  func.func @transform_5(%arg0: i32, %arg1: i32) -> (i32, i32) {
    %c0_i32 = arith.constant 0 : i32
    %c0_i32_0 = arith.constant 0 : i32
    %c0_i32_1 = arith.constant 0 : i32
    return %c0_i32, %c0_i32_0 : i32, i32
  }
  func.func @transform_6(%arg0: i32, %arg1: i32) -> (i32, i32) {
    %c0_i32 = arith.constant 0 : i32
    %c0_i32_0 = arith.constant 0 : i32
    %c0_i32_1 = arith.constant 0 : i32
    return %c0_i32, %c0_i32_0 : i32, i32
  }
  func.func @transform_7(%arg0: i32, %arg1: i32) -> (i32, i32) {
    %c0_i32 = arith.constant 0 : i32
    %c0_i32_0 = arith.constant 0 : i32
    %c0_i32_1 = arith.constant 0 : i32
    return %c0_i32, %c0_i32_0 : i32, i32
  }
  func.func @transform_8(%arg0: i32, %arg1: i32) -> (i32, i32) {
    %c0_i32 = arith.constant 0 : i32
    %c0_i32_0 = arith.constant 0 : i32
    %c0_i32_1 = arith.constant 0 : i32
    return %c0_i32, %c0_i32_0 : i32, i32
  }
  func.func @transform_9(%arg0: i32, %arg1: i32) -> (i32, i32, i32, i32) {
    %c0_i32 = arith.constant 0 : i32
    %c0_i32_0 = arith.constant 0 : i32
    %c0_i32_1 = arith.constant 0 : i32
    return %arg0, %arg1, %c0_i32, %c0_i32_0 : i32, i32, i32, i32
  }
  func.func @transform_10(%arg0: i32, %arg1: i32) -> (i32, i32, i32, i32) {
    %c0_i32 = arith.constant 0 : i32
    %c0_i32_0 = arith.constant 0 : i32
    %c0_i32_1 = arith.constant 0 : i32
    return %arg0, %arg1, %c0_i32, %c0_i32_0 : i32, i32, i32, i32
  }
}

module attributes {stable_mosaic.version = 11 : i64} {
  func.func @matmul_bias_kernel(%arg0: i32, %arg1: i32, %arg2: i32, %arg3: memref<16x128xbf16, #tpu.memory_space<vmem>>, %arg4: memref<128x256xbf16, #tpu.memory_space<vmem>>, %arg5: memref<1x256xf32, #tpu.memory_space<vmem>>, %arg6: memref<16x256xf32, #tpu.memory_space<vmem>>, %arg7: memref<16x256xf32, #tpu.memory_space<vmem>>) attributes {dimension_semantics = [#tpu.dimension_semantics<parallel>, #tpu.dimension_semantics<parallel>, #tpu.dimension_semantics<arbitrary>], iteration_bounds = array<i64: 1, 1, 1>, scalar_prefetch = 0 : i64, scratch_operands = 1 : i64, tpu.core_type = #tpu.core_type<tc>, window_params = [{transform_indices = @transform_0, window_bounds = array<i64: 16, 128>}, {transform_indices = @transform_1, window_bounds = array<i64: 128, 256>}, {transform_indices = @transform_2, window_bounds = array<i64: 1, 256>}, {transform_indices = @transform_3, window_bounds = array<i64: 16, 256>}]} {
    %c0_i32 = arith.constant 0 : i32
    %0 = arith.cmpi eq, %arg2, %c0_i32 : i32
    %1 = arith.extui %0 : i1 to i32
    %c0_i32_0 = arith.constant 0 : i32
    %2 = arith.cmpi ne, %1, %c0_i32_0 : i32
    scf.if %2 {
      %cst_10 = arith.constant 0.000000e+00 : f32
      %12 = vector.broadcast %cst_10 : f32 to vector<16x256xf32>
      %c0_11 = arith.constant 0 : index
      %c0_12 = arith.constant 0 : index
      %13 = vector.load %arg7[%c0_11, %c0_12] : memref<16x256xf32, #tpu.memory_space<vmem>>, vector<16x256xf32>
      tpu.vector_store %arg7[%c0_11, %c0_12], %12 {strides = array<i32>} : memref<16x256xf32, #tpu.memory_space<vmem>>, vector<16x256xf32>,
    } else {
    }
    %c0 = arith.constant 0 : index
    %c0_1 = arith.constant 0 : index
    %3 = vector.load %arg7[%c0, %c0_1] : memref<16x256xf32, #tpu.memory_space<vmem>>, vector<16x256xf32>
    %c0_2 = arith.constant 0 : index
    %c0_3 = arith.constant 0 : index
    %4 = vector.load %arg3[%c0_2, %c0_3] : memref<16x128xbf16, #tpu.memory_space<vmem>>, vector<16x128xbf16>
    %c0_4 = arith.constant 0 : index
    %c0_5 = arith.constant 0 : index
    %5 = vector.load %arg4[%c0_4, %c0_5] : memref<128x256xbf16, #tpu.memory_space<vmem>>, vector<128x256xbf16>
    %cst = arith.constant dense<0.000000e+00> : vector<16x256xf32>
    %6 = tpu.matmul %4, %5, %cst {dimension_numbers = #tpu.dot_dimension_numbers<[1], [0], [0], [1], [0, 0, 1, 1], [], []>} : vector<16x128xbf16>, vector<128x256xbf16>, vector<16x256xf32> -> vector<16x256xf32>
    %7 = arith.addf %3, %6 : vector<16x256xf32>
    %c0_6 = arith.constant 0 : index
    %c0_7 = arith.constant 0 : index
    %8 = vector.load %arg7[%c0_6, %c0_7] : memref<16x256xf32, #tpu.memory_space<vmem>>, vector<16x256xf32>
    tpu.vector_store %arg7[%c0_6, %c0_7], %7 {strides = array<i32>} : memref<16x256xf32, #tpu.memory_space<vmem>>, vector<16x256xf32>,
    %c0_i32_8 = arith.constant 0 : i32
    %9 = arith.cmpi eq, %arg2, %c0_i32_8 : i32
    %10 = arith.extui %9 : i1 to i32
    %c0_i32_9 = arith.constant 0 : i32
    %11 = arith.cmpi ne, %10, %c0_i32_9 : i32
    scf.if %11 {
      %c0_10 = arith.constant 0 : index
      %c0_11 = arith.constant 0 : index
      %12 = vector.load %arg7[%c0_10, %c0_11] : memref<16x256xf32, #tpu.memory_space<vmem>>, vector<16x256xf32>
      %c0_12 = arith.constant 0 : index
      %c0_13 = arith.constant 0 : index
      %13 = vector.load %arg5[%c0_12, %c0_13] : memref<1x256xf32, #tpu.memory_space<vmem>>, vector<1x256xf32>
      %14 = vector.broadcast %13 : vector<1x256xf32> to vector<16x256xf32>
      %15 = arith.addf %12, %14 : vector<16x256xf32>
      %c0_14 = arith.constant 0 : index
      %c0_15 = arith.constant 0 : index
      %16 = vector.load %arg6[%c0_14, %c0_15] : memref<16x256xf32, #tpu.memory_space<vmem>>, vector<16x256xf32>
      tpu.vector_store %arg6[%c0_14, %c0_15], %15 {strides = array<i32>} : memref<16x256xf32, #tpu.memory_space<vmem>>, vector<16x256xf32>,
    } else {
    }
    return
  }
  func.func @transform_0(%arg0: i32, %arg1: i32, %arg2: i32) -> (i32, i32) {
    %c0_i32 = arith.constant 0 : i32
    return %arg0, %arg2 : i32, i32
  }
  func.func @transform_1(%arg0: i32, %arg1: i32, %arg2: i32) -> (i32, i32) {
    %c0_i32 = arith.constant 0 : i32
    return %arg2, %arg1 : i32, i32
  }
  func.func @transform_2(%arg0: i32, %arg1: i32, %arg2: i32) -> (i32, i32) {
    %c0_i32 = arith.constant 0 : i32
    %c0_i32_0 = arith.constant 0 : i32
    return %c0_i32, %arg1 : i32, i32
  }
  func.func @transform_3(%arg0: i32, %arg1: i32, %arg2: i32) -> (i32, i32) {
    %c0_i32 = arith.constant 0 : i32
    return %arg0, %arg1 : i32, i32
  }
}

</mosaic_0001>

<bundles_post_ra>
// kernel: encoder_decoder_forward.7
= control target key start
LH: loop header
LB: loop body
LE: loop exit
PB: predicated region body
PF: predicated region fallthrough
CT: control target
= control target key end

     0   :  { %v256_v1 = vmov 0   ;;  %v191_v18 = vlaneseq  ;;  %s343_s1 = inlined_call_operand.vmem [shape: bf16[128,256], index: 1, kind: input, shape index: {}]   ;;  %s344_s0 = inlined_call_operand.vmem [shape: bf16[16,128], index: 0, kind: input, shape index: {}]   ;;  %s345_s2 = inlined_call_operand.vmem [shape: f32[1,256], index: 2, kind: input, shape index: {}]   ;;  %s346_s3 = inlined_call_operand.vmem [shape: f32[16,256], index: 3, kind: output, shape index: {}]  }
   0x1   :  { %v231_v0 = vld [vmem:[%s343_s1 + $0x4] ss:$8 sps:$4 sm:$0xff]   ;;  %163 = vmatprep.mubr.bf16.mxu0 %v256_v1  ;;  %v233_v2 = vld [vmem:[%s343_s1] ss:$8 sps:$4 sm:$0xff]   ;;  %v234_v3 = vld [vmem:[%s343_s1 + $0x14] ss:$8 sps:$4 sm:$0xff]  }
   0x2   :  { %131 = vmatprep.subr.bf16.mxu0 %v231_v0  ;;  %v236_v4 = vld [vmem:[%s343_s1 + $0x10] ss:$8 sps:$4 sm:$0xff]   ;;  %v237_v5 = vld [vmem:[%s343_s1 + $0x24] ss:$8 sps:$4 sm:$0xff]   ;;  %v239_v6 = vld [vmem:[%s343_s1 + $0x20] ss:$8 sps:$4 sm:$0xff]  }
   0x3   :  { %132 = vmatpush1.bf16.msra.mxu0 %v233_v2  ;;  %v240_v7 = vld [vmem:[%s343_s1 + $0x34] ss:$8 sps:$4 sm:$0xff]   ;;  %v242_v8 = vld [vmem:[%s343_s1 + $0x30] ss:$8 sps:$4 sm:$0xff]   ;;  %v243_v9 = vld [vmem:[%s343_s1 + $0x44] ss:$8 sps:$4 sm:$0xff]  }
   0x4   :  { %133 = vmatprep.subr.bf16.mxu0 %v234_v3  ;;  %v245_v10 = vld [vmem:[%s343_s1 + $0x40] ss:$8 sps:$4 sm:$0xff]   ;;  %v246_v11 = vld [vmem:[%s343_s1 + $0x54] ss:$8 sps:$4 sm:$0xff]   ;;  %v248_v12 = vld [vmem:[%s343_s1 + $0x50] ss:$8 sps:$4 sm:$0xff]  }
   0x5   :  { %v249_v13 = vld [vmem:[%s343_s1 + $0x64] ss:$8 sps:$4 sm:$0xff]   ;;  %v251_v14 = vld [vmem:[%s343_s1 + $0x60] ss:$8 sps:$4 sm:$0xff]   ;;  %v252_v15 = vld [vmem:[%s343_s1 + $0x74] ss:$8 sps:$4 sm:$0xff]  }
   0x6   :  { %v254_v16 = vld [vmem:[%s343_s1 + $0x70] ss:$8 sps:$4 sm:$0xff]   ;;  %v255_v17 = vld [vmem:[%s344_s0] sm:$0xff]   ;;  %v192_v19 = vshrl.u32 %v191_v18, 7 }
   0x7   :  { %134 = vmatpush1.bf16.msra.mxu0 %v236_v4  ;;  %v189_v21 = vld [vmem:[%s345_s2] sm:$0x3] }
   0x8   :  { %135 = vmatprep.subr.bf16.mxu0 %v237_v5  ;;  %v193_v20 = vsub.s32 0, %v192_v19  ;;  %v197_v22 = vsub.s32 1, %v192_v19 }
   0xa   :  { %v194_v23 = vrot.slane %v189_v21, %v193_v20  ;;  %v198_v24 = vrot.slane %v189_v21, %v197_v22 }
   0xb   :  { %136 = vmatpush1.bf16.msra.mxu0 %v239_v6 }
   0xc   :  { %137 = vmatprep.subr.bf16.mxu0 %v240_v7 }
   0xf   :  { %138 = vmatpush1.bf16.msra.mxu0 %v242_v8 }
  0x10   :  { %139 = vmatprep.subr.bf16.mxu0 %v243_v9 }
  0x13   :  { %140 = vmatpush1.bf16.msra.mxu0 %v245_v10 }
  0x14   :  { %141 = vmatprep.subr.bf16.mxu0 %v246_v11 }
  0x17   :  { %142 = vmatpush1.bf16.msra.mxu0 %v248_v12 }
  0x18   :  { %143 = vmatprep.subr.bf16.mxu0 %v249_v13 }
  0x1b   :  { %144 = vmatpush1.bf16.msra.mxu0 %v251_v14 }
  0x1c   :  { %145 = vmatprep.subr.bf16.mxu0 %v252_v15 }
  0x1f   :  { %146 = vmatpush1.bf16.msra.mxu0 %v254_v16 }
  0x22   :  { %164 = vmatmul.mubr.bf16.vlgmr.msra.gmra.mrb[0].mxu0 %v255_v17 }
  0xf5   :  { %v165_v25 = vpop.f32.mrb[0].mxu0 }
  0xf6   :  { %v201_v26 = vadd.f32 %v194_v23, %v165_v25  ;;  %v167_v27 = vpop.f32.mrb[1].mxu0 }
  0xf7   :  { %v202_v28 = vadd.f32 %v198_v24, %v167_v27  ;;  %v169_v29 = vpop.f32.mrb[2].mxu0 }
  0xf8   :  { %205 = vst [vmem:[%s346_s3] sm:$0xff] %v201_v26  ;;  %v203_v30 = vadd.f32 %v194_v23, %v169_v29  ;;  %v171_v31 = vpop.f32.mrb[3].mxu0 }
  0xf9   :  { %206 = vst [vmem:[%s346_s3 + $0x8] sm:$0xff] %v202_v28  ;;  %v204_v32 = vadd.f32 %v198_v24, %v171_v31 }
  0xfa   :  { %207 = vst [vmem:[%s346_s3 + $0x10] sm:$0xff] %v203_v30 }
  0xfb   :  { %208 = vst [vmem:[%s346_s3 + $0x18] sm:$0xff] %v204_v32 }

// kernel: encoder_decoder_forward.4
= control target key start
LH: loop header
LB: loop body
LE: loop exit
PB: predicated region body
PF: predicated region fallthrough
CT: control target
= control target key end

     0   :  { %vm133_vm0 = vcmask 1040384   ;;  %vm134_vm1 = vcmask 1041408   ;;  %vm108_vm2 = vcmask 23552   ;;  %v529_v1 = vmov 65535   ;;  %s612_s1 = inlined_call_operand.vmem [shape: bf16[3,128], index: 1, kind: input, shape index: {}]   ;;  %s613_s0 = inlined_call_operand.vmem [shape: bf16[128,3], index: 0, kind: input, shape index: {}]   ;;  %s614_s2 = inlined_call_operand.vmem [shape: f32[1,128], index: 2, kind: input, shape index: {}]   ;;  %s615_s3 = inlined_call_operand.vmem [shape: bf16[128,128], index: 3, kind: output, shape index: {}]  }
   0x1   :  { %v67_v0 = vld [vmem:[%s612_s1] sm:$0x3]  ;;  %v135_v2 = vsel %vm133_vm0, 4294967295, %v529_v1  ;;  %v523_v7 = vld [vmem:[%s613_s0 + $0x8] sm:$0xff]   ;;  %v525_v9 = vld [vmem:[%s613_s0 + $0x10] sm:$0xff]  }
   0x2   :  { %v521_v3 = vld [vmem:[%s613_s0] sm:$0xff]   ;;  %v136_v4 = vsel %vm134_vm1, %v135_v2, 0  ;;  %v524_v8 = vld [vmem:[%s613_s0 + $0x28] sm:$0xff]   ;;  %v526_v10 = vld [vmem:[%s613_s0 + $0x30] sm:$0xff]  }
   0x3   :  { %v522_v5 = vld [vmem:[%s613_s0 + $0x20] sm:$0xff]   ;;  %v138_v6 = vand.u32 %v136_v4, %v67_v0  ;;  %502 = vmatprep.mubr.msk.bf16.mxu0 %vm108_vm2, %v521_v3  ;;  %v527_v11 = vld [vmem:[%s613_s0 + $0x18] sm:$0xff]  }
   0x4   :  { %510 = vmatprep.mubr.msk.bf16.mxu1 %vm108_vm2, %v522_v5  ;;  %v528_v12 = vld [vmem:[%s613_s0 + $0x38] sm:$0xff]   ;;  %v411_v14 = vld [vmem:[%s614_s2] ss:$0 sm:$0xff] }
   0x5   :  { %500 = vmatprep.subr.bf16.mxu0 %v138_v6  ;;  %518 = vmatprep.subr.bf16.mxu1 %v138_v6 }
   0x6   :  { %501 = vmatpush3.bf16.msra.mxu0 %v138_v6  ;;  %519 = vmatpush3.bf16.msra.mxu1 %v138_v6 }
   0x9   :  { %503 = vmatmul.mubr.msk.bf16.vlgmr.msra.gmra.mrb[0].mxu0 %vm108_vm2, %v523_v7  ;;  %511 = vmatmul.mubr.msk.bf16.vlgmr.msra.gmra.mrb[0].mxu1 %vm108_vm2, %v524_v8 }
   0xa   :  { %506 = vmatprep.mubr.msk.bf16.mxu0 %vm108_vm2, %v525_v9  ;;  %514 = vmatprep.mubr.msk.bf16.mxu1 %vm108_vm2, %v526_v10 }
  0x11   :  { %507 = vmatmul.mubr.msk.bf16.gmra.mrb[4].mxu0 %vm108_vm2, %v527_v11  ;;  %515 = vmatmul.mubr.msk.bf16.gmra.mrb[4].mxu1 %vm108_vm2, %v528_v12 }
  0xdc   :  { %v504_v13 = vpop.f32.mrb[0].mxu0  ;;  %v512_v15 = vpop.f32.mrb[0].mxu1 }
  0xdd   :  { %v174_v16 = vpop.f32.mrb[1].mxu0  ;;  %v206_v17 = vpop.f32.mrb[1].mxu1  ;;  %v297_v20 = vadd.f32 %v504_v13, %v411_v14  ;;  %v305_v21 = vadd.f32 %v512_v15, %v411_v14 }
  0xde   :  { %v505_v18 = vpop.f32.mrb[2].mxu0  ;;  %v513_v19 = vpop.f32.mrb[2].mxu1  ;;  %v295_v26 = vadd.f32 %v411_v14, %v174_v16  ;;  %v303_v27 = vadd.f32 %v411_v14, %v206_v17 }
  0xdf   :  { %v298_v22 = vadd.f32 %v505_v18, %v411_v14  ;;  %v306_v23 = vadd.f32 %v513_v19, %v411_v14  ;;  %v177_v24 = vpop.f32.mrb[3].mxu0  ;;  %v209_v25 = vpop.f32.mrb[3].mxu1 }
  0xe0   :  { %v296_v28 = vadd.f32 %v411_v14, %v177_v24  ;;  %v304_v29 = vadd.f32 %v411_v14, %v209_v25 }
  0xe1   :  { %v452_v30 = vpack.c.bf16 %v298_v22, %v297_v20  ;;  %v472_v31 = vpack.c.bf16 %v306_v23, %v305_v21 }
  0xe2   :  { %v447_v32 = vpack.c.bf16 %v296_v28, %v295_v26  ;;  %v467_v33 = vpack.c.bf16 %v304_v29, %v303_v27 }
  0xe3   :  { %484 = vst [vmem:[%s615_s3 + $0x8] sm:$0xff] %v452_v30   ;;  %488 = vst [vmem:[%s615_s3 + $0x28] sm:$0xff] %v472_v31  }
  0xe4   :  { %448 = vst [vmem:[%s615_s3] sm:$0xff] %v447_v32   ;;  %487 = vst [vmem:[%s615_s3 + $0x20] sm:$0xff] %v467_v33   ;;  %v508_v34 = vpop.f32.mrb[4].mxu0  ;;  %v516_v35 = vpop.f32.mrb[4].mxu1 }
  0xe5   :  { %v190_v36 = vpop.f32.mrb[5].mxu0  ;;  %v222_v37 = vpop.f32.mrb[5].mxu1  ;;  %v301_v40 = vadd.f32 %v508_v34, %v411_v14  ;;  %v309_v41 = vadd.f32 %v516_v35, %v411_v14 }
  0xe6   :  { %v509_v38 = vpop.f32.mrb[6].mxu0  ;;  %v517_v39 = vpop.f32.mrb[6].mxu1  ;;  %v299_v46 = vadd.f32 %v411_v14, %v190_v36  ;;  %v307_v47 = vadd.f32 %v411_v14, %v222_v37 }
  0xe7   :  { %v302_v42 = vadd.f32 %v509_v38, %v411_v14  ;;  %v310_v43 = vadd.f32 %v517_v39, %v411_v14  ;;  %v193_v44 = vpop.f32.mrb[7].mxu0  ;;  %v225_v45 = vpop.f32.mrb[7].mxu1 }
  0xe8   :  { %v300_v48 = vadd.f32 %v411_v14, %v193_v44  ;;  %v308_v49 = vadd.f32 %v411_v14, %v225_v45 }
  0xe9   :  { %v462_v50 = vpack.c.bf16 %v302_v42, %v301_v40  ;;  %v482_v51 = vpack.c.bf16 %v310_v43, %v309_v41 }
  0xea   :  { %v457_v52 = vpack.c.bf16 %v300_v48, %v299_v46  ;;  %v477_v53 = vpack.c.bf16 %v308_v49, %v307_v47 }
  0xeb   :  { %486 = vst [vmem:[%s615_s3 + $0x18] sm:$0xff] %v462_v50   ;;  %490 = vst [vmem:[%s615_s3 + $0x38] sm:$0xff] %v482_v51  }
  0xec   :  { %485 = vst [vmem:[%s615_s3 + $0x10] sm:$0xff] %v457_v52   ;;  %489 = vst [vmem:[%s615_s3 + $0x30] sm:$0xff] %v477_v53  }

// kernel: encoder_decoder_forward.5
= control target key start
LH: loop header
LB: loop body
LE: loop exit
PB: predicated region body
PF: predicated region fallthrough
CT: control target
= control target key end

     0   :  { %s837_s12 = smov 0   ;;  %s839_s13 = smov 0   ;;  %s938_s0 = inlined_call_operand.vmem [shape: bf16[16,128], index: 0, kind: input, shape index: {}]   ;;  %s939_s1 = inlined_call_operand.vmem [shape: bf16[128,512], index: 1, kind: input, shape index: {}]   ;;  %s940_s2 = inlined_call_operand.vmem [shape: f32[1,512], index: 2, kind: input, shape index: {}]   ;;  %s941_s3 = inlined_call_operand.vmem [shape: f32[16,512], index: 3, kind: output, shape index: {}]  }
   0x1   :  { %s841_s14 = smov 0   ;;  %s843_s15 = smov 0  }
   0x2   :  { %s845_s16 = smov 0  }
   0x3 LB: > { %s28_s17 = sadd.s32 1, %s810_s15  ;;  %s674_s18 = sadd.s32 4294967295, %s814_s16   ;;  %s814_s16 = sphi %s845_s16, %s13_s16   ;;  %s810_s15 = sphi %s843_s15, %s946_s15   ;;  %s806_s14 = sphi %s841_s14, %s945_s14   ;;  %s802_s13 = sphi %s839_s13, %s944_s13   ;;  %s798_s12 = sphi %s837_s12, %s943_s12  }
   0x4   : > { %p30_p0 = scmp.ge.s32.totalorder %s28_s17, 2  ;;  %p76_p1 = scmp.ne.s32.totalorder %s802_s13, %s798_s12 }
   0x5   : > { %p77_p2 = scmp.eq.s32.totalorder %s814_s16, 0  ;;  %p134_p4 = scmp.eq.s32.totalorder %s674_s18, 1 }
   0x6   : > { %s948_s17 = smov (%p30_p0, %s28_s17), 0  ;;  %s69_s20 = sadd.s32 1, %s802_s13 }
   0x7   : > { %p78_p3 = por %p77_p2, %p76_p1  ;;  %s65_s19 = ssub.s32 %s810_s15, %s948_s17 }
   0x8   : > { %p67_p5 = scmp.eq.s32.totalorder %s65_s19, 0  ;;  %p872_p6 = por %p134_p4, %p76_p1 }
   0x9   : > { %p678_p7 = scmp.ge.s32.totalorder %s814_s16, 2 }
   0xa   : > { %s877_s22 = scalar_select %p67_p5, %s802_s13, %s69_s20  }
   0xb   : > { %168 = sbr.rel (%p678_p7) target bundleno = 30 (0x1e), region = 20 }
  0x12   : > { %171 = sbr.rel (!%p78_p3) target bundleno = 30 (0x1e), region = 24  ;;  %s173_s23 = sand.u32 (%p78_p3), 1, %s802_s13  }
  0x13   : > { %s708_s24 = sshll.u32 (%p78_p3), %s810_s15, 3  ;;  %s679_s25 = sshll.u32 (%p78_p3), %s173_s23, 7 }
  0x14   : > { %s885_s28 = scalar_lea.vmem (%p78_p3), %s939_s1, %s708_s24  ;;  %s175_s29 = scalar_lea.vmem (%p78_p3), [#allocation3], %s679_s25 }
  0x15   : > { %v239_v0 = vld [vmem:[%s885_s28] sm:$0xff] (%p78_p3)  ;;  %v241_v1 = vld [vmem:[%s885_s28 + $0x10] sm:$0xff] (%p78_p3) }
  0x16   : > { %v243_v2 = vld [vmem:[%s885_s28 + $0x20] sm:$0xff] (%p78_p3)  ;;  %240 = vst [vmem:[%s175_s29] sm:$0xff] (%p78_p3), %v239_v0  ;;  %242 = vst [vmem:[%s175_s29 + $0x8] sm:$0xff] (%p78_p3), %v241_v1  ;;  %v245_v3 = vld [vmem:[%s885_s28 + $0x30] sm:$0xff] (%p78_p3) }
  0x17   : > { %244 = vst [vmem:[%s175_s29 + $0x10] sm:$0xff] (%p78_p3), %v243_v2  ;;  %v247_v4 = vld [vmem:[%s885_s28 + $0x40] sm:$0xff] (%p78_p3)  ;;  %v249_v5 = vld [vmem:[%s885_s28 + $0x50] sm:$0xff] (%p78_p3)  ;;  %246 = vst [vmem:[%s175_s29 + $0x18] sm:$0xff] (%p78_p3), %v245_v3 }
  0x18   : > { %248 = vst [vmem:[%s175_s29 + $0x20] sm:$0xff] (%p78_p3), %v247_v4  ;;  %250 = vst [vmem:[%s175_s29 + $0x28] sm:$0xff] (%p78_p3), %v249_v5  ;;  %v251_v6 = vld [vmem:[%s885_s28 + $0x60] sm:$0xff] (%p78_p3)  ;;  %v253_v7 = vld [vmem:[%s885_s28 + $0x70] sm:$0xff] (%p78_p3) }
  0x19   : > { %v255_v8 = vld [vmem:[%s885_s28 + $0x80] sm:$0xff]  ;;  %252 = vst [vmem:[%s175_s29 + $0x30] sm:$0xff] %v251_v6  ;;  %254 = vst [vmem:[%s175_s29 + $0x38] sm:$0xff] %v253_v7  ;;  %v257_v9 = vld [vmem:[%s885_s28 + $0x90] sm:$0xff] }
  0x1a   : > { %256 = vst [vmem:[%s175_s29 + $0x40] sm:$0xff] %v255_v8  ;;  %v259_v10 = vld [vmem:[%s885_s28 + $0xa0] sm:$0xff]  ;;  %v261_v11 = vld [vmem:[%s885_s28 + $0xb0] sm:$0xff]  ;;  %258 = vst [vmem:[%s175_s29 + $0x48] sm:$0xff] %v257_v9 }
  0x1b   : > { %260 = vst [vmem:[%s175_s29 + $0x50] sm:$0xff] %v259_v10  ;;  %262 = vst [vmem:[%s175_s29 + $0x58] sm:$0xff] %v261_v11  ;;  %v263_v12 = vld [vmem:[%s885_s28 + $0xc0] sm:$0xff]  ;;  %v265_v13 = vld [vmem:[%s885_s28 + $0xd0] sm:$0xff] }
  0x1c   : > { %v267_v14 = vld [vmem:[%s885_s28 + $0xe0] sm:$0xff]  ;;  %264 = vst [vmem:[%s175_s29 + $0x60] sm:$0xff] %v263_v12  ;;  %266 = vst [vmem:[%s175_s29 + $0x68] sm:$0xff] %v265_v13  ;;  %v269_v15 = vld [vmem:[%s885_s28 + $0xf0] sm:$0xff] }
  0x1d   : > { %268 = vst [vmem:[%s175_s29 + $0x70] sm:$0xff] %v267_v14  ;;  %270 = vst [vmem:[%s175_s29 + $0x78] sm:$0xff] %v269_v15 }
  0x1e PF: > { %p682_p8 = scmp.ge.s32.totalorder %s814_s16, 1  ;;  %p283_p9 = scmp.lt.s32.totalorder %s814_s16, 3 }
  0x20   : > { %p284_p10 = pnand %p682_p8, %p283_p9 }
  0x21   : > { %s290_s30 = sand.u32 (!%p284_p10), 1, %s798_s12   ;;  %v816_v16 = vmov (!%p284_p10), 0   ;;  %v775_v33 = vld [vmem:[%s938_s0] sm:$0xff] (!%p284_p10)   ;;  %s685_s8 = sshll.u32 (!%p284_p10), %s806_s14, 1  ;;  %v519_v34 = vlaneseq (!%p284_p10) }
  0x22   : > { %287 = sbr.rel (%p284_p10) target bundleno = 295 (0x127), region = 66  ;;  %s683_s4 = sshll.u32 (!%p284_p10), %s290_s30, 7  ;;  %491 = vmatprep.mubr.bf16.mxu0 (!%p284_p10), %v816_v16 }
  0x23   : > { %s292_s5 = scalar_lea.vmem (!%p284_p10), [#allocation3], %s683_s4  ;;  %p336_p11 = scmp.lt.s32.totalorder (!%p284_p10), %s685_s8, 3  ;;  %v520_v35 = vshrl.u32 (!%p284_p10), %v519_v34, 7 }
  0x24   : > { %v751_v17 = vld [vmem:[%s292_s5 + $0x4] ss:$8 sps:$4 sm:$0xff] (!%p284_p10)   ;;  %v753_v18 = vld [vmem:[%s292_s5] ss:$8 sps:$4 sm:$0xff] (!%p284_p10)   ;;  %v754_v19 = vld [vmem:[%s292_s5 + $0x14] ss:$8 sps:$4 sm:$0xff] (!%p284_p10)  }
  0x25   : > { %459 = vmatprep.subr.bf16.mxu0 (!%p284_p10), %v751_v17  ;;  %v756_v20 = vld [vmem:[%s292_s5 + $0x10] ss:$8 sps:$4 sm:$0xff] (!%p284_p10)   ;;  %v757_v21 = vld [vmem:[%s292_s5 + $0x24] ss:$8 sps:$4 sm:$0xff] (!%p284_p10)   ;;  %v759_v22 = vld [vmem:[%s292_s5 + $0x20] ss:$8 sps:$4 sm:$0xff] (!%p284_p10)  }
  0x26   : > { %460 = vmatpush1.bf16.msra.mxu0 (!%p284_p10), %v753_v18  ;;  %v760_v23 = vld [vmem:[%s292_s5 + $0x34] ss:$8 sps:$4 sm:$0xff] (!%p284_p10)   ;;  %v762_v24 = vld [vmem:[%s292_s5 + $0x30] ss:$8 sps:$4 sm:$0xff] (!%p284_p10)   ;;  %v763_v25 = vld [vmem:[%s292_s5 + $0x44] ss:$8 sps:$4 sm:$0xff] (!%p284_p10)  }
  0x27   : > { %461 = vmatprep.subr.bf16.mxu0 (!%p284_p10), %v754_v19  ;;  %v765_v26 = vld [vmem:[%s292_s5 + $0x40] ss:$8 sps:$4 sm:$0xff] (!%p284_p10)   ;;  %v766_v27 = vld [vmem:[%s292_s5 + $0x54] ss:$8 sps:$4 sm:$0xff] (!%p284_p10)   ;;  %v768_v28 = vld [vmem:[%s292_s5 + $0x50] ss:$8 sps:$4 sm:$0xff] (!%p284_p10)  }
  0x28   : > { %v769_v29 = vld [vmem:[%s292_s5 + $0x64] ss:$8 sps:$4 sm:$0xff] (!%p284_p10)   ;;  %v771_v30 = vld [vmem:[%s292_s5 + $0x60] ss:$8 sps:$4 sm:$0xff] (!%p284_p10)   ;;  %v772_v31 = vld [vmem:[%s292_s5 + $0x74] ss:$8 sps:$4 sm:$0xff] (!%p284_p10)  }
  0x29   : > { %v774_v32 = vld [vmem:[%s292_s5 + $0x70] ss:$8 sps:$4 sm:$0xff]   ;;  %s950_s8 = smov (!%p336_p11, %s685_s8), 3  ;;  %v521_v36 = vsub.s32 0, %v520_v35  ;;  %v525_v38 = vsub.s32 1, %v520_v35  ;;  %s684_s18 = sshll.u32 %s290_s30, 5 }
  0x2a   : > { %462 = vmatpush1.bf16.msra.mxu0 %v756_v20  ;;  %s338_s11 = scalar_lea.vmem %s940_s2, %s950_s8  ;;  %s323_s19 = scalar_lea.vmem [#allocation4], %s684_s18 }
  0x2b   : > { %463 = vmatprep.subr.bf16.mxu0 %v757_v21  ;;  %v517_v37 = vld [vmem:[%s338_s11] sm:$0x3]  ;;  %s709_s12 = sshll.u32 (%p872_p6), %s806_s14, 4 }
  0x2c   : > { %v522_v39 = vrot.slane %v517_v37, %v521_v36  ;;  %v526_v40 = vrot.slane %v517_v37, %v525_v38  ;;  %s549_s24 = scalar_lea.vmem (%p872_p6), %s941_s3, %s709_s12 }
  0x2e   : > { %464 = vmatpush1.bf16.msra.mxu0 %v759_v22 }
  0x2f   : > { %465 = vmatprep.subr.bf16.mxu0 %v760_v23 }
  0x32   : > { %466 = vmatpush1.bf16.msra.mxu0 %v762_v24 }
  0x33   : > { %467 = vmatprep.subr.bf16.mxu0 %v763_v25 }
  0x36   : > { %468 = vmatpush1.bf16.msra.mxu0 %v765_v26 }
  0x37   : > { %469 = vmatprep.subr.bf16.mxu0 %v766_v27 }
  0x3a   : > { %470 = vmatpush1.bf16.msra.mxu0 %v768_v28 }
  0x3b   : > { %471 = vmatprep.subr.bf16.mxu0 %v769_v29 }
  0x3e   : > { %472 = vmatpush1.bf16.msra.mxu0 %v771_v30 }
  0x3f   : > { %473 = vmatprep.subr.bf16.mxu0 %v772_v31 }
  0x42   : > { %474 = vmatpush1.bf16.msra.mxu0 %v774_v32 }
  0x45   : > { %492 = vmatmul.mubr.bf16.vlgmr.msra.gmra.mrb[0].mxu0 %v775_v33 }
 0x118   : > { %v493_v41 = vpop.f32.mrb[0].mxu0  ;;  %543 = sbr.rel (!%p872_p6) target bundleno = 295 (0x127), region = 82 }
 0x119   : > { %v529_v42 = vadd.f32 %v522_v39, %v493_v41  ;;  %v495_v43 = vpop.f32.mrb[1].mxu0 }
 0x11a   : > { %v530_v44 = vadd.f32 %v526_v40, %v495_v43  ;;  %v497_v45 = vpop.f32.mrb[2].mxu0 }
 0x11b   : > { %533 = vst [vmem:[%s323_s19] sm:$0xff] %v529_v42  ;;  %v531_v46 = vadd.f32 %v522_v39, %v497_v45  ;;  %v499_v47 = vpop.f32.mrb[3].mxu0 }
 0x11c   : > { %534 = vst [vmem:[%s323_s19 + $0x8] sm:$0xff] %v530_v44  ;;  %v532_v48 = vadd.f32 %v526_v40, %v499_v47 }
 0x11d   : > { %535 = vst [vmem:[%s323_s19 + $0x10] sm:$0xff] %v531_v46 }
 0x11e   : > { %536 = vst [vmem:[%s323_s19 + $0x18] sm:$0xff] %v532_v48 }
 0x122   : > { %v562_v49 = vld [vmem:[%s323_s19] sm:$0xff] }
 0x123   : > { %v564_v50 = vld [vmem:[%s323_s19 + $0x8] sm:$0xff]  ;;  %563 = vst [vmem:[%s549_s24] sm:$0xff] %v562_v49 }
 0x124   : > { %v566_v51 = vld [vmem:[%s323_s19 + $0x10] sm:$0xff]  ;;  %565 = vst [vmem:[%s549_s24 + $0x8] sm:$0xff] %v564_v50 }
 0x125   : > { %v568_v52 = vld [vmem:[%s323_s19 + $0x18] sm:$0xff]  ;;  %567 = vst [vmem:[%s549_s24 + $0x20] sm:$0xff] %v566_v51 }
 0x126   : > { %569 = vst [vmem:[%s549_s24 + $0x28] sm:$0xff] %v568_v52 }
 0x127 PF: > { %s13_s16 = sadd.s32 1, %s814_s16   ;;  %s943_s12 = smov %s802_s13 }
 0x128   : > { %p10_p12 = scmp.ge.s32.totalorder %s13_s16, 4   ;;  %s944_s13 = smov %s877_s22 }
 0x129   : > { %s945_s14 = smov %s810_s15  ;;  %s946_s15 = smov %s948_s17 }
 0x12a   :  { %12 = sbr.rel (!%p10_p12) target bundleno = 3 (0x3), region = 142 }

// kernel: encoder_decoder_forward.6
= control target key start
LH: loop header
LB: loop body
LE: loop exit
PB: predicated region body
PF: predicated region fallthrough
CT: control target
= control target key end

     0   :  { %s3150_s13 = smov 0   ;;  %s3152_s14 = smov 0   ;;  %s4138_s0 = inlined_call_operand.vmem [shape: f32[1,8,2,512], index: 0, kind: input, shape index: {}]   ;;  %s4139_s1 = inlined_call_operand.vmem [shape: bf16[1,2,128,128], index: 1, kind: input, shape index: {}]   ;;  %s4140_s2 = inlined_call_operand.vmem [shape: bf16[128,128], index: 2, kind: input, shape index: {}]   ;;  %s4141_s3 = inlined_call_operand.vmem [shape: bf16[128,128], index: 3, kind: input, shape index: {}]   ;;  %s4142_s4 = inlined_call_operand.vmem [shape: f32[1,128], index: 4, kind: input, shape index: {}]   ;;  %s4143_s5 = inlined_call_operand.vmem [shape: f32[1,128], index: 5, kind: input, shape index: {}]   ;;  %s4144_s6 = inlined_call_operand.vmem [shape: bf16[128,256], index: 6, kind: input, shape index: {}]   ;;  %s4145_s7 = inlined_call_operand.vmem [shape: f32[1,256], index: 7, kind: input, shape index: {}]   ;;  %s4146_s8 = inlined_call_operand.vmem [shape: bf16[256,512], index: 8, kind: input, shape index: {}]   ;;  %s4147_s9 = inlined_call_operand.vmem [shape: bf16[1,8,2,128], index: 9, kind: output, shape index: {0}]   ;;  %s4148_s10 = inlined_call_operand.vmem [shape: f32[1,8,2,128], index: 10, kind: output, shape index: {1}]  }
   0x1   :  { %s3154_s15 = smov 0  }
   0x2 LB: > { %s30_s16 = sadd.s32 1, %s3084_s14  ;;  %p2501_p0 = scmp.ge.s32.totalorder %s3088_s15, 1  ;;  %s3088_s15 = sphi %s3154_s15, %s21_s15   ;;  %s3084_s14 = sphi %s3152_s14, %s4215_s14   ;;  %s3080_s13 = sphi %s3150_s13, %s4214_s13  }
   0x3   : > { %p31_p1 = scmp.ge.s32.totalorder %s30_s16, 8  ;;  %p337_p2 = scmp.lt.s32.totalorder %s3088_s15, 9 }
   0x5   : > { %s4217_s16 = smov (%p31_p1, %s30_s16), 0  ;;  %p338_p3 = pnand %p2501_p0, %p337_p2 }
   0x7   : > { %341 = sbr.rel (%p338_p3) target bundleno = 1628 (0x65c), region = 56 }
   0xe   : > { %p391_p4 = scmp.lt.s32.totalorder %s3080_s13, 7  ;;  %v3174_v0 = vld [vmem:[%s4139_s1] sm:$0xf]  ;;  %v3179_v1 = vld [vmem:[%s4139_s1 + $0x4] sm:$0xf]  ;;  %p2505_p5 = scmp.ne.s32.totalorder %s3080_s13, 0 }
   0xf   : > { %v3184_v2 = vld [vmem:[%s4139_s1 + $0x8] sm:$0xf]  ;;  %v3189_v3 = vld [vmem:[%s4139_s1 + $0xc] sm:$0xf]  ;;  %v3194_v4 = vld [vmem:[%s4139_s1 + $0x10] sm:$0xf]  ;;  %v453_v40 = vunpack.c.l.bf16 (!%p2505_p5), %v3174_v0  ;;  %v454_v41 = vunpack.c.l.bf16 (!%p2505_p5), %v3179_v1 }
  0x10   : > { %s3197_s27 = scalar_select %p391_p4, %s3080_s13, 7  ;;  %v3202_v5 = vld [vmem:[%s4139_s1 + $0x14] sm:$0xf]  ;;  %v3207_v6 = vld [vmem:[%s4139_s1 + $0x18] sm:$0xf] }
  0x11   : > { %v3212_v7 = vld [vmem:[%s4139_s1 + $0x1c] sm:$0xf]  ;;  %v3217_v8 = vld [vmem:[%s4139_s1 + $0x20] sm:$0xf]  ;;  %v3222_v9 = vld [vmem:[%s4139_s1 + $0x24] sm:$0xf]  ;;  %v455_v46 = vunpack.c.l.bf16 (!%p2505_p5), %v3184_v2  ;;  %v456_v50 = vunpack.c.l.bf16 (!%p2505_p5), %v3189_v3  ;;  %v485_v51 = vadd.f32 (!%p2505_p5), %v454_v41, %v453_v40  ;;  %v457_v55 = vunpack.c.l.bf16 (!%p2505_p5), %v3194_v4 }
  0x12   : > { %4173 = vst [vmem:[#allocation5_spill] sm:$0xff] %v3217_v8  ;;  %4174 = vst [vmem:[#allocation6_spill] sm:$0xff] %v3222_v9  ;;  %s2641_s22 = sshll.u32 %s3197_s27, 3  ;;  %s404_s25 = scalar_lea.vmem %s4147_s9, %s3197_s27  ;;  %v3232_v10 = vld [vmem:[%s4139_s1 + $0x28] sm:$0xf]  ;;  %v3354_v32 = vld [vmem:[%s4140_s2] sm:$0xff] (!%p2505_p5)   ;;  %v2527_v33 = vcombine.low (!%p2505_p5), %v3217_v8, %v3222_v9  ;;  %v458_v61 = vunpack.c.l.bf16 (!%p2505_p5), %v3202_v5 }
  0x13   : > { %4175 = vst [vmem:[#allocation7_spill] sm:$0xff] %v3232_v10  ;;  %v3237_v11 = vld [vmem:[%s4139_s1 + $0x2c] sm:$0xf]  ;;  %s3242_s17 = scalar_lea.vmem %s4138_s0, %s2641_s22  ;;  %s2504_s18 = sshll.u32 %s3197_s27, 1  ;;  %v3248_v12 = vld [vmem:[%s4139_s1 + $0x30] sm:$0xf]  ;;  %2801 = vmatprep.subr.bf16.mxu1 (!%p2505_p5), %v3354_v32  ;;  %v486_v56 = vadd.f32 (!%p2505_p5), %v485_v51, %v455_v46 }
  0x14   : > { %4176 = vst [vmem:[#allocation8_spill] sm:$0xff] %v3237_v11  ;;  %4177 = vst [vmem:[#allocation9_spill] sm:$0xff] %v3248_v12  ;;  %v3253_v13 = vld [vmem:[%s4139_s1 + $0x34] sm:$0xf]  ;;  %s3258_s28 = scalar_lea.vmem %s4148_s10, %s2504_s18  ;;  %v3263_v14 = vld [vmem:[%s4139_s1 + $0x38] sm:$0xf]  ;;  %2717 = vmatprep.mubr.bf16.mxu1 (!%p2505_p5), %v2527_v33  ;;  %2809 = vmatpush3.bf16.msra.mxu1 (!%p2505_p5), %v3354_v32 }
  0x15   : > { %4178 = vst [vmem:[#allocation10_spill] sm:$0xff] %v3253_v13  ;;  %4179 = vst [vmem:[#allocation11_spill] sm:$0xff] %v3263_v14  ;;  %v3268_v15 = vld [vmem:[%s4139_s1 + $0x3c] sm:$0xf]  ;;  %v3273_v16 = vld [vmem:[%s4139_s1 + $0x40] sm:$0xf]  ;;  %v487_v62 = vadd.f32 (!%p2505_p5), %v486_v56, %v456_v50 }
  0x16   : > { %4180 = vst [vmem:[#allocation12_spill] sm:$0xff] %v3268_v15  ;;  %v3278_v17 = vld [vmem:[%s4139_s1 + $0x44] sm:$0xf]  ;;  %v3283_v18 = vld [vmem:[%s4139_s1 + $0x48] sm:$0xf]  ;;  %v3090_v35 = vmov (!%p2505_p5), 0   ;;  %v469_v43 = vunpack.c.l.bf16 (!%p2505_p5), %v3273_v16 }
  0x17   : > { %v3288_v19 = vld [vmem:[%s4139_s1 + $0x4c] sm:$0xf]  ;;  %v3293_v20 = vld [vmem:[%s4139_s1 + $0x50] sm:$0xf]  ;;  %v3298_v21 = vld [vmem:[%s4139_s1 + $0x54] sm:$0xf]  ;;  %679 = vmatprep.mubr.bf16.mxu0 (!%p2505_p5), %v3090_v35  ;;  %v470_v44 = vunpack.c.l.bf16 (!%p2505_p5), %v3278_v17  ;;  %v471_v48 = vunpack.c.l.bf16 (!%p2505_p5), %v3283_v18  ;;  %v459_v35 = vunpack.c.l.bf16 (!%p2505_p5), %v3207_v6 }
  0x18   : > { %v3303_v22 = vld [vmem:[%s4139_s1 + $0x58] sm:$0xf]  ;;  %v3308_v23 = vld [vmem:[%s4139_s1 + $0x5c] sm:$0xf]  ;;  %v3313_v24 = vld [vmem:[%s4139_s1 + $0x60] sm:$0xf]  ;;  %v472_v53 = vunpack.c.l.bf16 (!%p2505_p5), %v3288_v19  ;;  %v473_v58 = vunpack.c.l.bf16 (!%p2505_p5), %v3293_v20  ;;  %v474_v33 = vunpack.c.l.bf16 (!%p2505_p5), %v3298_v21 }
  0x19   : > { %4181 = vst [vmem:[#allocation13_spill] sm:$0xff] %v3303_v22  ;;  %4182 = vst [vmem:[#allocation14_spill] sm:$0xff] %v3308_v23  ;;  %v3318_v25 = vld [vmem:[%s4139_s1 + $0x64] sm:$0xf]  ;;  %v3323_v26 = vld [vmem:[%s4139_s1 + $0x68] sm:$0xf]  ;;  %v506_v54 = vadd.f32 (!%p2505_p5), %v470_v44, %v469_v43  ;;  %v460_v43 = vunpack.c.l.bf16 (!%p2505_p5), %v3212_v7  ;;  %v476_v46 = vunpack.c.l.bf16 (!%p2505_p5), %v3308_v23  ;;  %v477_v51 = vunpack.c.l.bf16 (!%p2505_p5), %v3313_v24 }
  0x1a   : > { %4183 = vst [vmem:[#allocation15_spill] sm:$0xff] %v3313_v24  ;;  %4184 = vst [vmem:[#allocation16_spill] sm:$0xff] %v3318_v25  ;;  %v3328_v27 = vld [vmem:[%s4139_s1 + $0x6c] sm:$0xf]  ;;  %v3333_v28 = vld [vmem:[%s4139_s1 + $0x70] sm:$0xf] }
  0x1b   : > { %4185 = vst [vmem:[#allocation17_spill] sm:$0xff] %v3323_v26  ;;  %4186 = vst [vmem:[#allocation18_spill] sm:$0xff] %v3328_v27  ;;  %v3338_v29 = vld [vmem:[%s4139_s1 + $0x74] sm:$0xf]  ;;  %v3343_v30 = vld [vmem:[%s4139_s1 + $0x78] sm:$0xf]  ;;  %v507_v59 = vadd.f32 (!%p2505_p5), %v506_v54, %v471_v48  ;;  %v461_v48 = vunpack.c.l.bf16 (!%p2505_p5), %v3217_v8 }
  0x1c   : > { %4187 = vst [vmem:[#allocation19_spill] sm:$0xff] %v3333_v28  ;;  %4188 = vst [vmem:[#allocation20_spill] sm:$0xff] %v3338_v29  ;;  %v3348_v31 = vld [vmem:[%s4139_s1 + $0x7c] sm:$0xf]  ;;  %452 = sbr.rel (%p2505_p5) target bundleno = 340 (0x154), region = 60  ;;  %v3369_v37 = vld [vmem:[%s4140_s2 + $0x8] sm:$0xff] (!%p2505_p5)  }
  0x1d   : > { %4189 = vst [vmem:[#allocation21_spill] sm:$0xff] %v3343_v30  ;;  %4190 = vst [vmem:[#allocation22_spill] sm:$0xff] %v3348_v31  ;;  %v2847_v34 = vld [vmem:[%s4144_s6 + $0x4] ss:$8 sps:$4 sm:$0xff] (!%p2505_p5)   ;;  %v2849_v36 = vld [vmem:[%s4144_s6] ss:$8 sps:$4 sm:$0xff] (!%p2505_p5)   ;;  %2802 = vmatprep.subr.bf16.mxu1 (!%p2505_p5), %v3369_v37 }
  0x1e   : > { %647 = vmatprep.subr.bf16.mxu0 (!%p2505_p5), %v2847_v34  ;;  %v2851_v38 = vld [vmem:[%s4144_s6 + $0x14] ss:$8 sps:$4 sm:$0xff] (!%p2505_p5)   ;;  %v2853_v39 = vld [vmem:[%s4144_s6 + $0x10] ss:$8 sps:$4 sm:$0xff] (!%p2505_p5)   ;;  %v2855_v45 = vld [vmem:[%s4144_s6 + $0x24] ss:$8 sps:$4 sm:$0xff] (!%p2505_p5)   ;;  %2810 = vmatpush3.bf16.msra.mxu1 (!%p2505_p5), %v3369_v37  ;;  %v508_v34 = vadd.f32 (!%p2505_p5), %v507_v59, %v472_v53 }
  0x1f   : > { %648 = vmatpush1.bf16.msra.mxu0 (!%p2505_p5), %v2849_v36  ;;  %v3383_v42 = vld [vmem:[%s4140_s2 + $0x10] sm:$0xff] (!%p2505_p5)   ;;  %v2857_v47 = vld [vmem:[%s4144_s6 + $0x20] ss:$8 sps:$4 sm:$0xff] (!%p2505_p5)   ;;  %v3400_v49 = vld [vmem:[%s4140_s2 + $0x18] sm:$0xff] (!%p2505_p5)   ;;  %v488_v36 = vadd.f32 (!%p2505_p5), %v487_v62, %v457_v55  ;;  %v462_v55 = vunpack.c.l.bf16 (!%p2505_p5), %v3222_v9  ;;  %vm563_vm0 = vcmask (!%p2505_p5), 1041409  }
  0x20   : > { %649 = vmatprep.subr.bf16.mxu0 (!%p2505_p5), %v2851_v38  ;;  %2803 = vmatprep.subr.bf16.mxu1 (!%p2505_p5), %v3383_v42  ;;  %v2859_v52 = vld [vmem:[%s4144_s6 + $0x34] ss:$8 sps:$4 sm:$0xff] (!%p2505_p5)   ;;  %v2861_v57 = vld [vmem:[%s4144_s6 + $0x30] ss:$8 sps:$4 sm:$0xff] (!%p2505_p5)   ;;  %v3417_v60 = vld [vmem:[%s4140_s2 + $0x20] sm:$0xff] (!%p2505_p5)   ;;  %v509_v40 = vadd.f32 (!%p2505_p5), %v508_v34, %v473_v58  ;;  %v478_v58 = vunpack.c.l.bf16 (!%p2505_p5), %v3318_v25 }
  0x21   : > { %v2863_v63 = vld [vmem:[%s4144_s6 + $0x44] ss:$8 sps:$4 sm:$0xff] (!%p2505_p5)   ;;  %v2865_v38 = vld [vmem:[%s4144_s6 + $0x40] ss:$8 sps:$4 sm:$0xff] (!%p2505_p5)   ;;  %v489_v44 = vadd.f32 (!%p2505_p5), %v488_v36, %v458_v61  ;;  %v2869_v53 = vld [vmem:[%s4144_s6 + $0x50] ss:$8 sps:$4 sm:$0xff] (!%p2505_p5)   ;;  %v463_v61 = vunpack.c.l.bf16 (!%p2505_p5), %v3232_v10  ;;  %v464_v36 = vunpack.c.l.bf16 (!%p2505_p5), %v3237_v11 }
  0x22   : > { %2811 = vmatpush3.bf16.msra.mxu1 (!%p2505_p5), %v3383_v42  ;;  %v3434_v41 = vld [vmem:[%s4140_s2 + $0x28] sm:$0xff] (!%p2505_p5)   ;;  %v3451_v54 = vld [vmem:[%s4140_s2 + $0x30] sm:$0xff] (!%p2505_p5)  }
  0x23   : > { %650 = vmatpush1.bf16.msra.mxu0 %v2853_v39  ;;  %2804 = vmatprep.subr.bf16.mxu1 %v3400_v49  ;;  %v475_v39 = vunpack.c.l.bf16 %v3303_v22  ;;  %v490_v50 = vadd.f32 %v489_v44, %v459_v35  ;;  %v2873_v34 = vld [vmem:[%s4144_s6 + $0x60] ss:$8 sps:$4 sm:$0xff]   ;;  %v3468_v35 = vld [vmem:[%s4140_s2 + $0x38] sm:$0xff]   ;;  %v465_v44 = vunpack.c.l.bf16 %v3248_v12 }
  0x24   : > { %651 = vmatprep.subr.bf16.mxu0 %v2855_v45  ;;  %v2867_v45 = vld [vmem:[%s4144_s6 + $0x54] ss:$8 sps:$4 sm:$0xff]  }
  0x25   : > { %v491_v56 = vadd.f32 %v490_v50, %v460_v43  ;;  %v466_v50 = vunpack.c.l.bf16 %v3253_v13 }
  0x26   : > { %2812 = vmatpush3.bf16.msra.mxu1 %v3400_v49 }
  0x27   : > { %652 = vmatpush1.bf16.msra.mxu0 %v2857_v47  ;;  %2805 = vmatprep.subr.bf16.mxu1 %v3417_v60  ;;  %v510_v47 = vadd.f32 %v509_v40, %v474_v33  ;;  %v492_v62 = vadd.f32 %v491_v56, %v461_v48  ;;  %v480_v40 = vunpack.c.l.bf16 %v3328_v27  ;;  %v2877_v48 = vld [vmem:[%s4144_s6 + $0x70] ss:$8 sps:$4 sm:$0xff]   ;;  %v467_v56 = vunpack.c.l.bf16 %v3263_v14 }
  0x28   : > { %653 = vmatprep.subr.bf16.mxu0 %v2859_v52 }
  0x29   : > { %v511_v52 = vadd.f32 %v510_v47, %v475_v39  ;;  %v2875_v39 = vld [vmem:[%s4144_s6 + $0x74] ss:$8 sps:$4 sm:$0xff]  }
  0x2a   : > { %2813 = vmatpush3.bf16.msra.mxu1 %v3417_v60 }
  0x2b   : > { %654 = vmatpush1.bf16.msra.mxu0 %v2861_v57  ;;  %2806 = vmatprep.subr.bf16.mxu1 %v3434_v41  ;;  %v2871_v57 = vld [vmem:[%s4144_s6 + $0x64] ss:$8 sps:$4 sm:$0xff]   ;;  %v512_v59 = vadd.f32 %v511_v52, %v476_v46  ;;  %v481_v46 = vunpack.c.l.bf16 %v3333_v28  ;;  %v482_v52 = vunpack.c.l.bf16 %v3338_v29 }
  0x2c   : > { %655 = vmatprep.subr.bf16.mxu0 %v2863_v63  ;;  %v479_v63 = vunpack.c.l.bf16 %v3323_v26 }
  0x2d   : > { %v513_v33 = vadd.f32 %v512_v59, %v477_v51 }
  0x2e   : > { %2814 = vmatpush3.bf16.msra.mxu1 %v3434_v41 }
  0x2f   : > { %656 = vmatpush1.bf16.msra.mxu0 %v2865_v38  ;;  %2807 = vmatprep.subr.bf16.mxu1 %v3451_v54  ;;  %v493_v38 = vadd.f32 %v492_v62, %v462_v55  ;;  %v514_v43 = vadd.f32 %v513_v33, %v478_v58  ;;  %v2528_v55 = vcombine.low %v3232_v10, %v3237_v11  ;;  %v483_v58 = vunpack.c.l.bf16 %v3343_v30 }
  0x30   : > { %657 = vmatprep.subr.bf16.mxu0 %v2867_v45  ;;  %v468_v62 = vunpack.c.l.bf16 %v3268_v15  ;;  %v484_v33 = vunpack.c.l.bf16 %v3348_v31 }
  0x31   : > { %v494_v45 = vadd.f32 %v493_v38, %v463_v61  ;;  %v515_v47 = vadd.f32 %v514_v43, %v479_v63  ;;  %v2529_v61 = vcombine.low %v3248_v12, %v3253_v13 }
  0x32   : > { %2815 = vmatpush3.bf16.msra.mxu1 %v3451_v54 }
  0x33   : > { %658 = vmatpush1.bf16.msra.mxu0 %v2869_v53  ;;  %2808 = vmatprep.subr.bf16.mxu1 %v3468_v35  ;;  %v495_v51 = vadd.f32 %v494_v45, %v464_v36  ;;  %v516_v53 = vadd.f32 %v515_v47, %v480_v40 }
  0x34   : > { %659 = vmatprep.subr.bf16.mxu0 %v2871_v57 }
  0x35   : > { %v496_v57 = vadd.f32 %v495_v51, %v465_v44  ;;  %v517_v59 = vadd.f32 %v516_v53, %v481_v46  ;;  %v2530_v44 = vcombine.low %v3263_v14, %v3268_v15  ;;  %v2531_v46 = vcombine.low %v3273_v16, %v3278_v17 }
  0x36   : > { %2816 = vmatpush3.bf16.msra.mxu1 %v3468_v35 }
  0x37   : > { %660 = vmatpush1.bf16.msra.mxu0 %v2873_v34  ;;  %v497_v63 = vadd.f32 %v496_v57, %v466_v50  ;;  %v518_v34 = vadd.f32 %v517_v59, %v482_v52 }
  0x38   : > { %661 = vmatprep.subr.bf16.mxu0 %v2875_v39 }
  0x39   : > { %2718 = vmatmul.mubr.bf16.vlgmr.msra.gmra.mrb[0].mxu1 %v2528_v55  ;;  %v498_v36 = vadd.f32 %v497_v63, %v467_v56  ;;  %v519_v38 = vadd.f32 %v518_v34, %v483_v58  ;;  %v2532_v56 = vcombine.low %v3283_v18, %v3288_v19  ;;  %v2533_v58 = vcombine.low %v3293_v20, %v3298_v21 }
  0x3a   : > { %2721 = vmatprep.mubr.bf16.mxu1 %v2529_v61 }
  0x3b   : > { %662 = vmatpush1.bf16.msra.mxu0 %v2877_v48  ;;  %v499_v39 = vadd.f32 %v498_v36, %v468_v62  ;;  %v520_v40 = vadd.f32 %v519_v38, %v484_v33  ;;  %v2534_v38 = vcombine.low %v3303_v22, %v3308_v23 }
  0x3c   : > { %2693 = vmatprep.subr.bf16.mxu0 %v3354_v32 }
  0x3d   : > { %v500_v43 = vrot.slane %v499_v39, 4  ;;  %v521_v45 = vrot.slane %v520_v40, 4 }
  0x3f   : > { %v501_v47 = vadd.f32 %v500_v43, %v499_v39  ;;  %v522_v48 = vadd.f32 %v521_v45, %v520_v40  ;;  %v2535_v40 = vcombine.low %v3313_v24, %v3318_v25 }
  0x41   : > { %v502_v50 = vrot.slane %v501_v47, 2  ;;  %2722 = vmatmul.mubr.bf16.gmra.mrb[4].mxu1 %v2530_v44  ;;  %v523_v51 = vrot.slane %v522_v48, 2  ;;  %v2523_v44 = vcombine.low %v3174_v0, %v3179_v1 }
  0x42   : > { %2725 = vmatprep.mubr.bf16.mxu1 %v2531_v46  ;;  %v2536_v46 = vcombine.low %v3323_v26, %v3328_v27 }
  0x43   : > { %v503_v52 = vadd.f32 %v502_v50, %v501_v47  ;;  %v524_v53 = vadd.f32 %v523_v51, %v522_v48  ;;  %v2537_v47 = vcombine.low %v3333_v28, %v3338_v29 }
  0x45   : > { %v504_v55 = vrot.slane %v503_v52, 1  ;;  %v525_v57 = vrot.slane %v524_v53, 1 }
  0x47   : > { %v505_v59 = vadd.f32 %v504_v55, %v503_v52  ;;  %v526_v61 = vadd.f32 %v525_v57, %v524_v53 }
  0x49   : > { %v527_v62 = vmul.f32 0.015625, %v505_v59  ;;  %2726 = vmatmul.mubr.bf16.gmra.mrb[8].mxu1 %v2532_v56  ;;  %v528_v63 = vmul.f32 0.015625, %v526_v61  ;;  %v549_v61 = vlaneseq }
  0x4a   : > { %2729 = vmatprep.mubr.bf16.mxu1 %v2533_v58 }
  0x4b   : > { %v529_v33 = vpack.c.bf16 %v527_v62, %v527_v62  ;;  %v530_v34 = vpack.c.bf16 %v528_v63, %v528_v63 }
  0x4d   : > { %v561_v36 = vunpack.c.l.b16 %v529_v33  ;;  %v562_v39 = vunpack.c.l.b16 %v530_v34  ;;  %v550_v34 = vshrl.u32 %v549_v61, 7 }
  0x4f   : > { %v564_v43 = vsel %vm563_vm0, %v562_v39, %v561_v36 }
  0x50   : > { %v565_v45 = vpack.c.b16 %v564_v43, %v564_v43 }
  0x51   : > { %2730 = vmatmul.mubr.bf16.gmra.mrb[12].mxu1 %v2534_v38 }
  0x52   : > { %2733 = vmatprep.mubr.bf16.mxu1 %v2535_v40  ;;  %680 = vmatmul.mubr.bf16.vlgmr.msra.gmra.mrb[0].mxu0 %v565_v45 }
  0x53   : > { %2694 = vmatpush3.bf16.msra.mxu0 %v3354_v32  ;;  %2709 = vmatprep.mubr.bf16.mxu0 %v2523_v44  ;;  %v2538_v32 = vcombine.low %v3343_v30, %v3348_v31  ;;  %v551_v44 = vsub.s32 0, %v550_v34 }
  0x54   : > { %2695 = vmatprep.subr.bf16.mxu0 %v3369_v37 }
  0x57   : > { %2696 = vmatpush3.bf16.msra.mxu0 %v3369_v37  ;;  %v2524_v37 = vcombine.low %v3184_v2, %v3189_v3 }
  0x58   : > { %2697 = vmatprep.subr.bf16.mxu0 %v3383_v42 }
  0x59   : > { %2734 = vmatmul.mubr.bf16.gmra.mrb[16].mxu1 %v2536_v46 }
  0x5a   : > { %2737 = vmatprep.mubr.bf16.mxu1 %v2537_v47  ;;  %v547_v47 = vld [vmem:[%s4145_s7] sm:$0x3] }
  0x5b   : > { %2698 = vmatpush3.bf16.msra.mxu0 %v3383_v42  ;;  %v2525_v42 = vcombine.low %v3194_v4, %v3202_v5 }
  0x5c   : > { %2699 = vmatprep.subr.bf16.mxu0 %v3400_v49 }
  0x5f   : > { %2700 = vmatpush3.bf16.msra.mxu0 %v3400_v49  ;;  %v2526_v49 = vcombine.low %v3207_v6, %v3212_v7 }
  0x60   : > { %2701 = vmatprep.subr.bf16.mxu0 %v3417_v60 }
  0x61   : > { %2738 = vmatmul.mubr.bf16.gmra.mrb[20].mxu1 %v2538_v32  ;;  %v555_v32 = vsub.s32 1, %v550_v34 }
  0x63   : > { %2702 = vmatpush3.bf16.msra.mxu0 %v3417_v60  ;;  %v3538_v60 = vld [vmem:[%s4142_s4] ss:$0 sm:$0xff] }
  0x64   : > { %2703 = vmatprep.subr.bf16.mxu0 %v3434_v41 }
  0x67   : > { %2704 = vmatpush3.bf16.msra.mxu0 %v3434_v41 }
  0x68   : > { %2705 = vmatprep.subr.bf16.mxu0 %v3451_v54 }
  0x6b   : > { %2706 = vmatpush3.bf16.msra.mxu0 %v3451_v54 }
  0x6c   : > { %2707 = vmatprep.subr.bf16.mxu0 %v3468_v35 }
  0x6f   : > { %2708 = vmatpush3.bf16.msra.mxu0 %v3468_v35 }
  0x72   : > { %2710 = vmatmul.mubr.bf16.vlgmr.msra.gmra.mrb[4].mxu0 %v2524_v37 }
  0x73   : > { %2713 = vmatprep.mubr.bf16.mxu0 %v2525_v42  ;;  %v552_v42 = vrot.slane %v547_v47, %v551_v44 }
  0x7a   : > { %2714 = vmatmul.mubr.bf16.gmra.mrb[8].mxu0 %v2526_v49  ;;  %v556_v49 = vrot.slane %v547_v47, %v555_v32 }
 0x10c   : > { %v2719_v41 = vpop.f32.mrb[0].mxu1 }
 0x10d   : > { %v932_v54 = vadd.f32 %v2719_v41, %v3538_v60  ;;  %v923_v48 = vpop.f32.mrb[1].mxu1 }
 0x10e   : > { %v924_v35 = vadd.f32 %v3538_v60, %v923_v48  ;;  %v2720_v50 = vpop.f32.mrb[2].mxu1 }
 0x10f   : > { %1028 = vst [vmem:[#allocation4 + $0x50] sm:$0xff] %v932_v54  ;;  %v935_v51 = vadd.f32 %v2720_v50, %v3538_v60  ;;  %v926_v52 = vpop.f32.mrb[3].mxu1 }
 0x110   : > { %1026 = vst [vmem:[#allocation4 + $0x40] sm:$0xff] %v924_v35  ;;  %v927_v53 = vadd.f32 %v3538_v60, %v926_v52 }
 0x111   : > { %1029 = vst [vmem:[#allocation4 + $0x58] sm:$0xff] %v935_v51 }
 0x112   : > { %1027 = vst [vmem:[#allocation4 + $0x48] sm:$0xff] %v927_v53 }
 0x114   : > { %v2723_v55 = vpop.f32.mrb[4].mxu1 }
 0x115   : > { %v948_v56 = vadd.f32 %v2723_v55, %v3538_v60  ;;  %v939_v57 = vpop.f32.mrb[5].mxu1 }
 0x116   : > { %v940_v58 = vadd.f32 %v3538_v60, %v939_v57  ;;  %v2724_v59 = vpop.f32.mrb[6].mxu1 }
 0x117   : > { %1032 = vst [vmem:[#allocation4 + $0x70] sm:$0xff] %v948_v56  ;;  %v951_v62 = vadd.f32 %v2724_v59, %v3538_v60  ;;  %v942_v63 = vpop.f32.mrb[7].mxu1 }
 0x118   : > { %1030 = vst [vmem:[#allocation4 + $0x60] sm:$0xff] %v940_v58  ;;  %v943_v33 = vadd.f32 %v3538_v60, %v942_v63 }
 0x119   : > { %1033 = vst [vmem:[#allocation4 + $0x78] sm:$0xff] %v951_v62 }
 0x11a   : > { %1031 = vst [vmem:[#allocation4 + $0x68] sm:$0xff] %v943_v33 }
 0x11c   : > { %v2727_v36 = vpop.f32.mrb[8].mxu1 }
 0x11d   : > { %v964_v38 = vadd.f32 %v2727_v36, %v3538_v60  ;;  %v955_v39 = vpop.f32.mrb[9].mxu1 }
 0x11e   : > { %v956_v40 = vadd.f32 %v3538_v60, %v955_v39  ;;  %v2728_v43 = vpop.f32.mrb[10].mxu1 }
 0x11f   : > { %1036 = vst [vmem:[#allocation4 + $0x90] sm:$0xff] %v964_v38  ;;  %v967_v45 = vadd.f32 %v2728_v43, %v3538_v60  ;;  %v958_v46 = vpop.f32.mrb[11].mxu1 }
 0x120   : > { %1034 = vst [vmem:[#allocation4 + $0x80] sm:$0xff] %v956_v40  ;;  %v959_v37 = vadd.f32 %v3538_v60, %v958_v46 }
 0x121   : > { %1037 = vst [vmem:[#allocation4 + $0x98] sm:$0xff] %v967_v45 }
 0x122   : > { %1035 = vst [vmem:[#allocation4 + $0x88] sm:$0xff] %v959_v37 }
 0x124   : > { %v2731_v41 = vpop.f32.mrb[12].mxu1 }
 0x125   : > { %v980_v54 = vadd.f32 %v2731_v41, %v3538_v60  ;;  %v971_v48 = vpop.f32.mrb[13].mxu1  ;;  %v681_v35 = vpop.f32.mrb[0].mxu0 }
 0x126   : > { %v972_v50 = vadd.f32 %v3538_v60, %v971_v48  ;;  %v2732_v51 = vpop.f32.mrb[14].mxu1  ;;  %v682_v52 = vadd.f32 %v681_v35, %v552_v42  ;;  %v683_v53 = vpop.f32.mrb[1].mxu0 }
 0x127   : > { %1040 = vst [vmem:[#allocation4 + $0xb0] sm:$0xff] %v980_v54  ;;  %v983_v55 = vadd.f32 %v2732_v51, %v3538_v60  ;;  %v974_v56 = vpop.f32.mrb[15].mxu1  ;;  %v684_v57 = vadd.f32 %v683_v53, %v556_v49  ;;  %v685_v58 = vpop.f32.mrb[2].mxu0 }
 0x128   : > { %1038 = vst [vmem:[#allocation4 + $0xa0] sm:$0xff] %v972_v50  ;;  %v975_v59 = vadd.f32 %v3538_v60, %v974_v56  ;;  %688 = vst [vmem:[#allocation2] sm:$0x3] %v682_v52  ;;  %v686_v61 = vpop.f32.mrb[3].mxu0 }
 0x129   : > { %1041 = vst [vmem:[#allocation4 + $0xb8] sm:$0xff] %v983_v55  ;;  %689 = vst [vmem:[#allocation3] sm:$0x3] %v684_v57 }
 0x12a   : > { %1039 = vst [vmem:[#allocation4 + $0xa8] sm:$0xff] %v975_v59 }
 0x12c   : > { %v2735_v62 = vpop.f32.mrb[16].mxu1 }
 0x12d   : > { %v996_v63 = vadd.f32 %v2735_v62, %v3538_v60  ;;  %v987_v33 = vpop.f32.mrb[17].mxu1 }
 0x12e   : > { %v988_v34 = vadd.f32 %v3538_v60, %v987_v33  ;;  %v2736_v36 = vpop.f32.mrb[18].mxu1 }
 0x12f   : > { %1044 = vst [vmem:[#allocation4 + $0xd0] sm:$0xff] %v996_v63  ;;  %v999_v38 = vadd.f32 %v2736_v36, %v3538_v60  ;;  %v990_v39 = vpop.f32.mrb[19].mxu1 }
 0x130   : > { %1042 = vst [vmem:[#allocation4 + $0xc0] sm:$0xff] %v988_v34  ;;  %v991_v40 = vadd.f32 %v3538_v60, %v990_v39 }
 0x131   : > { %1045 = vst [vmem:[#allocation4 + $0xd8] sm:$0xff] %v999_v38 }
 0x132   : > { %1043 = vst [vmem:[#allocation4 + $0xc8] sm:$0xff] %v991_v40 }
 0x134   : > { %v2739_v43 = vpop.f32.mrb[20].mxu1 }
 0x135   : > { %v1012_v44 = vadd.f32 %v2739_v43, %v3538_v60  ;;  %v1003_v45 = vpop.f32.mrb[21].mxu1 }
 0x136   : > { %v1004_v46 = vadd.f32 %v3538_v60, %v1003_v45  ;;  %v2740_v47 = vpop.f32.mrb[22].mxu1 }
 0x137   : > { %1048 = vst [vmem:[#allocation4 + $0xf0] sm:$0xff] %v1012_v44  ;;  %v1015_v32 = vadd.f32 %v2740_v47, %v3538_v60  ;;  %v1006_v37 = vpop.f32.mrb[23].mxu1 }
 0x138   : > { %1046 = vst [vmem:[#allocation4 + $0xe0] sm:$0xff] %v1004_v46  ;;  %v1007_v42 = vadd.f32 %v3538_v60, %v1006_v37 }
 0x139   : > { %1049 = vst [vmem:[#allocation4 + $0xf8] sm:$0xff] %v1015_v32 }
 0x13a   : > { %1047 = vst [vmem:[#allocation4 + $0xe8] sm:$0xff] %v1007_v42 }
 0x145   : > { %v2711_v49 = vpop.f32.mrb[4].mxu0 }
 0x146   : > { %v900_v41 = vadd.f32 %v2711_v49, %v3538_v60  ;;  %v891_v54 = vpop.f32.mrb[5].mxu0 }
 0x147   : > { %v892_v48 = vadd.f32 %v3538_v60, %v891_v54  ;;  %v2712_v35 = vpop.f32.mrb[6].mxu0 }
 0x148   : > { %1020 = vst [vmem:[#allocation4 + $0x10] sm:$0xff] %v900_v41  ;;  %v903_v50 = vadd.f32 %v2712_v35, %v3538_v60  ;;  %v894_v51 = vpop.f32.mrb[7].mxu0 }
 0x149   : > { %1018 = vst [vmem:[#allocation4] sm:$0xff] %v892_v48  ;;  %v895_v52 = vadd.f32 %v3538_v60, %v894_v51 }
 0x14a   : > { %1021 = vst [vmem:[#allocation4 + $0x18] sm:$0xff] %v903_v50 }
 0x14b   : > { %1019 = vst [vmem:[#allocation4 + $0x8] sm:$0xff] %v895_v52 }
 0x14d   : > { %v2715_v53 = vpop.f32.mrb[8].mxu0 }
 0x14e   : > { %v916_v55 = vadd.f32 %v2715_v53, %v3538_v60  ;;  %v907_v56 = vpop.f32.mrb[9].mxu0 }
 0x14f   : > { %v908_v57 = vadd.f32 %v3538_v60, %v907_v56  ;;  %v2716_v58 = vpop.f32.mrb[10].mxu0 }
 0x150   : > { %1024 = vst [vmem:[#allocation4 + $0x30] sm:$0xff] %v916_v55  ;;  %v919_v59 = vadd.f32 %v2716_v58, %v3538_v60  ;;  %v910_v61 = vpop.f32.mrb[11].mxu0 }
 0x151   : > { %1022 = vst [vmem:[#allocation4 + $0x20] sm:$0xff] %v908_v57  ;;  %v911_v62 = vadd.f32 %v3538_v60, %v910_v61 }
 0x152   : > { %1025 = vst [vmem:[#allocation4 + $0x38] sm:$0xff] %v919_v59 }
 0x153   : > { %1023 = vst [vmem:[#allocation4 + $0x28] sm:$0xff] %v911_v62 }
 0x154 PF: > { %v2878_v63 = vld [vmem:[%s4141_s3] sm:$0xff]   ;;  %v4149_v33 = vmov 0.0   ;;  %v2879_v34 = vld [vmem:[%s4141_s3 + $0x8] sm:$0xff]   ;;  %vm3092_vm1 = vmmov 0   ;;  %v2880_v60 = vld [vmem:[%s4141_s3 + $0x10] sm:$0xff]   ;;  %v1193_v32 = vlaneseq  ;;  %vm1433_vm2 = vcmask 130112  }
 0x155   : > { %2741 = vmatprep.subr.bf16.mxu0 %v4149_v33  ;;  %2761 = vmatprep.subr.bf16.mxu1 %v4149_v33  ;;  %v2881_v36 = vld [vmem:[%s4141_s3 + $0x18] sm:$0xff]   ;;  %v2882_v38 = vld [vmem:[%s4141_s3 + $0x20] sm:$0xff]   ;;  %v2883_v39 = vld [vmem:[%s4141_s3 + $0x28] sm:$0xff]   ;;  %v3093_v46 = vmov 1966171168   ;;  %vm1440_vm3 = vcmask 195712  }
 0x156   : > { %2742 = vmatpush3.bf16.msra.mxu0 %v2878_v63  ;;  %2757 = vmatprep.mubr.msk.bf16.mxu0 %vm3092_vm1, %v4149_v33  ;;  %v2884_v40 = vld [vmem:[%s4141_s3 + $0x30] sm:$0xff]   ;;  %v2885_v43 = vld [vmem:[%s4141_s3 + $0x38] sm:$0xff]   ;;  %v1050_v44 = vld [vmem:[#allocation2] sm:$0x3]  ;;  %v1191_v47 = vunpack.c.l.s4 %v3093_v46  ;;  %v3619_v42 = vshrl.u32 %v1193_v32, 7  ;;  %vm1447_vm4 = vcmask 261312  }
 0x157   : > { %2743 = vmatprep.subr.bf16.mxu0 %v4149_v33  ;;  %2777 = vmatprep.mubr.msk.bf16.mxu1 %vm3092_vm1, %v4149_v33  ;;  %v3612_v45 = vpack.c.bf16 %v1050_v44, %v1050_v44  ;;  %v1157_v55 = vld [vmem:[#allocation4] sm:$0xff]  ;;  %v1158_v56 = vld [vmem:[#allocation4 + $0x8] sm:$0xff]  ;;  %v1176_v46 = vld [vmem:[#allocation4 + $0x98] sm:$0xff]  ;;  %vm1454_vm5 = vcmask 326912   ;;  %vm1461_vm6 = vcmask 392512   ;;  %vm1468_vm7 = vcmask 458112  }
 0x158   : > { %v1192_v37 = vunpack.c.0.s8 %v1191_v47  ;;  %v1214_v48 = vsub.s32 0, %v3619_v42  ;;  %v1173_v59 = vld [vmem:[#allocation4 + $0x80] sm:$0xff]  ;;  %v1174_v61 = vld [vmem:[#allocation4 + $0x88] sm:$0xff]  ;;  %vm1475_vm8 = vcmask 523712   ;;  %vm1482_vm9 = vcmask 589312  }
 0x159   : > { %4191 = vst [vmem:[#allocation23_spill] sm:$0xff] %v3612_v45  ;;  %vm1489_vm10 = vcmask 654912   ;;  %vm1496_vm11 = vcmask 720512   ;;  %vm1503_vm12 = vcmask 786112   ;;  %vm1510_vm13 = vcmask 851712  }
 0x15a   : > { %2744 = vmatpush3.bf16.msra.mxu0 %v2879_v34  ;;  %v3622_v49 = vsub.s32 %v1192_v37, %v3619_v42  ;;  %v1161_v37 = vld [vmem:[#allocation4 + $0x20] sm:$0xff]  ;;  %vm1517_vm14 = vcmask 917312   ;;  %vm1524_vm15 = vcmask 982912   ;;  %vm1531_vm0 = vcmask 1048512  }
 0x15b   : > { %2745 = vmatprep.subr.bf16.mxu0 %v4149_v33 }
 0x15c   : > { %4192 = vst [vmem:[#allocation24_spill] sm:$0xff] %v3622_v49 }
 0x15e   : > { %2746 = vmatpush3.bf16.msra.mxu0 %v2880_v60  ;;  %v1159_v60 = vld [vmem:[#allocation4 + $0x10] sm:$0xff] }
 0x15f   : > { %2747 = vmatprep.subr.bf16.mxu0 %v4149_v33 }
 0x162   : > { %2748 = vmatpush3.bf16.msra.mxu0 %v2881_v36 }
 0x163   : > { %2749 = vmatprep.subr.bf16.mxu0 %v4149_v33 }
 0x166   : > { %2750 = vmatpush3.bf16.msra.mxu0 %v2882_v38 }
 0x167   : > { %2751 = vmatprep.subr.bf16.mxu0 %v4149_v33 }
 0x16a   : > { %2752 = vmatpush3.bf16.msra.mxu0 %v2883_v39  ;;  %v1175_v39 = vld [vmem:[#allocation4 + $0x90] sm:$0xff] }
 0x16b   : > { %2753 = vmatprep.subr.bf16.mxu0 %v4149_v33 }
 0x16e   : > { %2754 = vmatpush3.bf16.msra.mxu0 %v2884_v40 }
 0x16f   : > { %2755 = vmatprep.subr.bf16.mxu0 %v4149_v33 }
 0x172   : > { %2756 = vmatpush3.bf16.msra.mxu0 %v2885_v43  ;;  %v1160_v43 = vld [vmem:[#allocation4 + $0x18] sm:$0xff] }
 0x173   : > { %2781 = vmatprep.subr.bf16.mxu0 %v4149_v33 }
 0x175   : > { %2758 = vmatmul.mubr.bf16.vlgmr.msra.gmra.mrb[0].mxu0 %v3612_v45 }
 0x176   : > { %2797 = vmatprep.mubr.msk.bf16.mxu0 %vm3092_vm1, %v4149_v33  ;;  %vm1612_vm1 = vcmask 1041409  }
 0x248   : > { %v1151_v41 = vpop.f32.mrb[0].mxu0 }
 0x249   : > { %v1196_v54 = vrot.slane %v1151_v41, %v3622_v49  ;;  %v2759_v35 = vpop.f32.mrb[1].mxu0  ;;  %v3642_v41 = vld [vmem:[%s4143_s5] ss:$0 sm:$0xff] }
 0x24a   : > { %v1154_v50 = vpop.f32.mrb[2].mxu0 }
 0x24b   : > { %v1197_v51 = vcombine.high %v1196_v54, %v1196_v54  ;;  %v1204_v52 = vrot.slane %v1196_v54, %v3622_v49  ;;  %v2760_v53 = vpop.f32.mrb[3].mxu0 }
 0x24c   : > { %v1162_v53 = vld [vmem:[#allocation4 + $0x28] sm:$0xff] }
 0x24d   : > { %v1211_v57 = vrot.slane %v1197_v51, %v3622_v49  ;;  %v3628_v58 = vrot.slane %v1204_v52, %v1214_v48 }
 0x24f   : > { %v3630_v62 = vrot.slane %v1211_v57, %v1214_v48  ;;  %v1222_v63 = vadd.f32 %v3628_v58, %v1157_v55  ;;  %v1223_v34 = vadd.f32 %v3628_v58, %v1158_v56  ;;  %v1224_v40 = vadd.f32 %v3628_v58, %v1159_v60  ;;  %v1177_v48 = vld [vmem:[#allocation4 + $0xa0] sm:$0xff]  ;;  %v1163_v60 = vld [vmem:[#allocation4 + $0x30] sm:$0xff] }
 0x250   : > { %v1225_v47 = vadd.f32 %v3628_v58, %v1160_v43  ;;  %v1226_v50 = vadd.f32 %v3628_v58, %v1161_v37 }
 0x251   : > { %2982 = vtanh.f32 %v1222_v63  ;;  %v1238_v36 = vadd.f32 %v3630_v62, %v1173_v59  ;;  %v1239_v38 = vadd.f32 %v3630_v62, %v1174_v61  ;;  %v1240_v44 = vadd.f32 %v3630_v62, %v1175_v39  ;;  %v1178_v59 = vld [vmem:[#allocation4 + $0xa8] sm:$0xff] }
 0x252   : > { %2984 = vtanh.f32 %v1223_v34  ;;  %v1241_v54 = vadd.f32 %v3630_v62, %v1176_v46  ;;  %v1242_v56 = vadd.f32 %v3630_v62, %v1177_v48  ;;  %v1227_v63 = vadd.f32 %v3628_v58, %v1162_v53  ;;  %v1165_v53 = vld [vmem:[#allocation4 + $0x40] sm:$0xff] }
 0x253   : > { %2986 = vtanh.f32 %v1238_v36 }
 0x254   : > { %2988 = vtanh.f32 %v1239_v38  ;;  %v1243_v38 = vadd.f32 %v3630_v62, %v1178_v59  ;;  %v1181_v59 = vld [vmem:[#allocation4 + $0xc0] sm:$0xff] }
 0x255   : > { %2990 = vtanh.f32 %v1224_v40  ;;  %v1179_v40 = vld [vmem:[#allocation4 + $0xb0] sm:$0xff] }
 0x256   : > { %2992 = vtanh.f32 %v1240_v44  ;;  %v1228_v44 = vadd.f32 %v3628_v58, %v1163_v60  ;;  %v1166_v60 = vld [vmem:[#allocation4 + $0x48] sm:$0xff] }
 0x257   : > { %2994 = vtanh.f32 %v1225_v47  ;;  %v1164_v47 = vld [vmem:[#allocation4 + $0x38] sm:$0xff] }
 0x258   : > { %2996 = vtanh.f32 %v1241_v54  ;;  %v1244_v54 = vadd.f32 %v3630_v62, %v1179_v40  ;;  %v1182_v40 = vld [vmem:[#allocation4 + $0xc8] sm:$0xff] }
 0x259   : > { %2998 = vtanh.f32 %v1226_v50 }
 0x25a   : > { %3000 = vtanh.f32 %v1242_v56 }
 0x25b   : > { %v2983_v35 = vpop.eup %2982  ;;  %3002 = vtanh.f32 %v1227_v63  ;;  %v1230_v63 = vadd.f32 %v3628_v58, %v1165_v53  ;;  %v1168_v53 = vld [vmem:[#allocation4 + $0x58] sm:$0xff] }
 0x25c   : > { %v2985_v51 = vpop.eup %2984  ;;  %v1293_v52 = vmul.f32 %v2983_v35, %v3642_v41  ;;  %3004 = vtanh.f32 %v1243_v38  ;;  %v1180_v35 = vld [vmem:[#allocation4 + $0xb8] sm:$0xff]  ;;  %v1246_v38 = vadd.f32 %v3630_v62, %v1181_v59 }
 0x25d   : > { %v2987_v55 = vpop.eup %2986  ;;  %v1294_v34 = vmul.f32 %v2985_v51, %v3642_v41  ;;  %3006 = vtanh.f32 %v1228_v44  ;;  %v1229_v51 = vadd.f32 %v3628_v58, %v1164_v47  ;;  %v1245_v56 = vadd.f32 %v3630_v62, %v1180_v35  ;;  %v1167_v47 = vld [vmem:[#allocation4 + $0x50] sm:$0xff]  ;;  %v1184_v59 = vld [vmem:[#allocation4 + $0xd8] sm:$0xff] }
 0x25e   : > { %1325 = vadd.xlane.f32.xlu0 %v1293_v52  ;;  %v1309_v57 = vmul.f32 %v2987_v55, %v3642_v41  ;;  %v2989_v61 = vpop.eup %2988  ;;  %3008 = vtanh.f32 %v1244_v54  ;;  %v1231_v44 = vadd.f32 %v3628_v58, %v1166_v60  ;;  %v1247_v54 = vadd.f32 %v3630_v62, %v1182_v40  ;;  %v1183_v35 = vld [vmem:[#allocation4 + $0xd0] sm:$0xff]  ;;  %v1169_v60 = vld [vmem:[#allocation4 + $0x60] sm:$0xff] }
 0x25f   : > { %v2991_v36 = vpop.eup %2990  ;;  %v1310_v39 = vmul.f32 %v2989_v61, %v3642_v41  ;;  %3010 = vtanh.f32 %v1229_v51  ;;  %v1232_v51 = vadd.f32 %v3628_v58, %v1167_v47  ;;  %v1185_v40 = vld [vmem:[#allocation4 + $0xe0] sm:$0xff]  ;;  %v1170_v47 = vld [vmem:[#allocation4 + $0x68] sm:$0xff] }
 0x260   : > { %1357 = vadd.xlane.f32.xlu1 %v1309_v57  ;;  %v2993_v43 = vpop.eup %2992  ;;  %v1295_v46 = vmul.f32 %v2991_v36, %v3642_v41  ;;  %3012 = vtanh.f32 %v1245_v56  ;;  %v1248_v56 = vadd.f32 %v3630_v62, %v1183_v35  ;;  %v1186_v35 = vld [vmem:[#allocation4 + $0xe8] sm:$0xff] }
 0x261   : > { %v2995_v37 = vpop.eup %2994  ;;  %v1311_v48 = vmul.f32 %v2993_v43, %v3642_v41  ;;  %3014 = vtanh.f32 %v1230_v63  ;;  %v1233_v63 = vadd.f32 %v3628_v58, %v1168_v53  ;;  %v1171_v53 = vld [vmem:[#allocation4 + $0x70] sm:$0xff] }
 0x262   : > { %1327 = vadd.xlane.f32.xlu0 %v1294_v34  ;;  %v2997_v50 = vpop.eup %2996  ;;  %v1296_v52 = vmul.f32 %v2995_v37, %v3642_v41  ;;  %3016 = vtanh.f32 %v1246_v38  ;;  %v1249_v38 = vadd.f32 %v3630_v62, %v1184_v59  ;;  %v1187_v59 = vld [vmem:[#allocation4 + $0xf0] sm:$0xff] }
 0x263   : > { %v2999_v55 = vpop.eup %2998  ;;  %v1312_v57 = vmul.f32 %v2997_v50, %v3642_v41  ;;  %3018 = vtanh.f32 %v1231_v44  ;;  %v1234_v44 = vadd.f32 %v3628_v58, %v1169_v60  ;;  %v1172_v60 = vld [vmem:[#allocation4 + $0x78] sm:$0xff] }
 0x264   : > { %1359 = vadd.xlane.f32.xlu1 %v1310_v39  ;;  %v3001_v61 = vpop.eup %3000  ;;  %v1297_v34 = vmul.f32 %v2999_v55, %v3642_v41  ;;  %3020 = vtanh.f32 %v1247_v54  ;;  %v1250_v54 = vadd.f32 %v3630_v62, %v1185_v40  ;;  %v1188_v40 = vld [vmem:[#allocation4 + $0xf8] sm:$0xff] }
 0x265   : > { %v3003_v36 = vpop.eup %3002  ;;  %v1313_v39 = vmul.f32 %v3001_v61, %v3642_v41  ;;  %3022 = vtanh.f32 %v1232_v51  ;;  %v1235_v51 = vadd.f32 %v3628_v58, %v1170_v47 }
 0x266   : > { %1329 = vadd.xlane.f32.xlu0 %v1295_v46  ;;  %v3005_v43 = vpop.eup %3004  ;;  %v1298_v46 = vmul.f32 %v3003_v36, %v3642_v41  ;;  %3024 = vtanh.f32 %v1248_v56  ;;  %v1251_v56 = vadd.f32 %v3630_v62, %v1186_v35 }
 0x267   : > { %v3007_v37 = vpop.eup %3006  ;;  %3026 = vtanh.f32 %v1233_v63  ;;  %v1236_v63 = vadd.f32 %v3628_v58, %v1171_v53 }
 0x268   : > { %1361 = vadd.xlane.f32.xlu1 %v1311_v48  ;;  %v1314_v48 = vmul.f32 %v3005_v43, %v3642_v41  ;;  %v3009_v50 = vpop.eup %3008  ;;  %3028 = vtanh.f32 %v1249_v38  ;;  %v1252_v38 = vadd.f32 %v3630_v62, %v1187_v59 }
 0x269   : > { %v3011_v55 = vpop.eup %3010  ;;  %3030 = vtanh.f32 %v1234_v44  ;;  %v1237_v44 = vadd.f32 %v3628_v58, %v1172_v60 }
 0x26a   : > { %1331 = vadd.xlane.f32.xlu0 %v1296_v52  ;;  %v1299_v52 = vmul.f32 %v3007_v37, %v3642_v41  ;;  %v3013_v61 = vpop.eup %3012  ;;  %3032 = vtanh.f32 %v1250_v54 }
 0x26b   : > { %v3015_v36 = vpop.eup %3014  ;;  %3034 = vtanh.f32 %v1235_v51 }
 0x26c   : > { %1363 = vadd.xlane.f32.xlu1 %v1312_v57  ;;  %v1315_v57 = vmul.f32 %v3009_v50, %v3642_v41  ;;  %v3017_v43 = vpop.eup %3016  ;;  %3036 = vtanh.f32 %v1251_v56 }
 0x26d   : > { %v3019_v37 = vpop.eup %3018  ;;  %3038 = vtanh.f32 %v1236_v63 }
 0x26e   : > { %1333 = vadd.xlane.f32.xlu0 %v1297_v34  ;;  %v1300_v34 = vmul.f32 %v3011_v55, %v3642_v41  ;;  %v3021_v50 = vpop.eup %3020  ;;  %3040 = vtanh.f32 %v1252_v38 }
 0x26f   : > { %v3023_v55 = vpop.eup %3022  ;;  %3042 = vtanh.f32 %v1237_v44 }
 0x270   : > { %1365 = vadd.xlane.f32.xlu1 %v1313_v39  ;;  %v1316_v39 = vmul.f32 %v3013_v61, %v3642_v41  ;;  %v3025_v61 = vpop.eup %3024 }
 0x272   : > { %1335 = vadd.xlane.f32.xlu0 %v1298_v46  ;;  %v1301_v46 = vmul.f32 %v3015_v36, %v3642_v41  ;;  %v3027_v36 = vpop.eup %3026 }
 0x274   : > { %1367 = vadd.xlane.f32.xlu1 %v1314_v48  ;;  %v1317_v48 = vmul.f32 %v3017_v43, %v3642_v41  ;;  %v3029_v43 = vpop.eup %3028 }
 0x275   : > { %v3031_v47 = vpop.eup %3030  ;;  %v1320_v54 = vmul.f32 %v3029_v43, %v3642_v41 }
 0x276   : > { %1337 = vadd.xlane.f32.xlu0 %v1299_v52  ;;  %v1302_v52 = vmul.f32 %v3019_v37, %v3642_v41  ;;  %v1253_v37 = vadd.f32 %v3630_v62, %v1188_v40  ;;  %v1305_v35 = vmul.f32 %v3031_v47, %v3642_v41 }
 0x278   : > { %1369 = vadd.xlane.f32.xlu1 %v1315_v57  ;;  %v1318_v57 = vmul.f32 %v3021_v50, %v3642_v41  ;;  %3044 = vtanh.f32 %v1253_v37 }
 0x27a   : > { %1339 = vadd.xlane.f32.xlu0 %v1300_v34  ;;  %v1303_v34 = vmul.f32 %v3023_v55, %v3642_v41 }
 0x27c   : > { %1371 = vadd.xlane.f32.xlu1 %v1316_v39  ;;  %v1319_v39 = vmul.f32 %v3025_v61, %v3642_v41 }
 0x27e   : > { %1341 = vadd.xlane.f32.xlu0 %v1301_v46  ;;  %v1304_v46 = vmul.f32 %v3027_v36, %v3642_v41 }
 0x280   : > { %1373 = vadd.xlane.f32.xlu1 %v1317_v48  ;;  %v3033_v48 = vpop.eup %3032 }
 0x281   : > { %v3035_v50 = vpop.eup %3034  ;;  %v1321_v58 = vmul.f32 %v3033_v48, %v3642_v41 }
 0x282   : > { %1343 = vadd.xlane.f32.xlu0 %v1302_v52  ;;  %v3037_v51 = vpop.eup %3036  ;;  %v1306_v52 = vmul.f32 %v3035_v50, %v3642_v41 }
 0x283   : > { %v3039_v53 = vpop.eup %3038  ;;  %v1322_v62 = vmul.f32 %v3037_v51, %v3642_v41 }
 0x284   : > { %1375 = vadd.xlane.f32.xlu1 %v1318_v57  ;;  %v3041_v55 = vpop.eup %3040  ;;  %v1307_v56 = vmul.f32 %v3039_v53, %v3642_v41 }
 0x285   : > { %v3043_v57 = vpop.eup %3042  ;;  %v1323_v59 = vmul.f32 %v3041_v55, %v3642_v41 }
 0x286   : > { %1345 = vadd.xlane.f32.xlu0 %v1303_v34  ;;  %v3045_v61 = vpop.eup %3044  ;;  %v1308_v63 = vmul.f32 %v3043_v57, %v3642_v41 }
 0x287   : > { %v1324_v34 = vmul.f32 %v3045_v61, %v3642_v41 }
 0x288   : > { %1377 = vadd.xlane.f32.xlu1 %v1319_v39 }
 0x28a   : > { %1347 = vadd.xlane.f32.xlu0 %v1304_v46 }
 0x28c   : > { %1379 = vadd.xlane.f32.xlu1 %v1320_v54 }
 0x28e   : > { %1349 = vadd.xlane.f32.xlu0 %v1305_v35 }
 0x290   : > { %1381 = vadd.xlane.f32.xlu1 %v1321_v58 }
 0x292   : > { %1351 = vadd.xlane.f32.xlu0 %v1306_v52  ;;  %v3736_v52 = vand.u32 127, %v1193_v32 }
 0x294   : > { %1383 = vadd.xlane.f32.xlu1 %v1322_v62  ;;  %v1428_v62 = vadd.s32 4294967288, %v3736_v52  ;;  %v1426_v61 = vsub.s32 %v3736_v52, %v3619_v42  ;;  %v1449_v32 = vadd.s32 4294967264, %v3736_v52  ;;  %v1456_v33 = vadd.s32 4294967256, %v3736_v52 }
 0x295   : > { %v1463_v45 = vadd.s32 4294967248, %v3736_v52  ;;  %v1470_v49 = vadd.s32 4294967240, %v3736_v52  ;;  %v1477_v31 = vadd.s32 4294967232, %v3736_v52  ;;  %v1484_v14 = vadd.s32 4294967224, %v3736_v52 }
 0x296   : > { %1353 = vadd.xlane.f32.xlu0 %v1307_v56  ;;  %v1435_v56 = vadd.s32 4294967280, %v3736_v52  ;;  %v1491_v28 = vadd.s32 4294967216, %v3736_v52  ;;  %v1498_v29 = vadd.s32 4294967208, %v3736_v52  ;;  %v1452_v12 = vsub.s32 %v1449_v32, %v3619_v42 }
 0x297   : > { %v1512_v26 = vadd.s32 4294967192, %v3736_v52  ;;  %v1459_v27 = vsub.s32 %v1456_v33, %v3619_v42  ;;  %v1466_v10 = vsub.s32 %v1463_v45, %v3619_v42  ;;  %v3773_v11 = vsub.s32 %v1477_v31, %v3619_v42 }
 0x298   : > { %1385 = vadd.xlane.f32.xlu1 %v1323_v59  ;;  %v1442_v59 = vadd.s32 4294967272, %v3736_v52  ;;  %v1438_v30 = vsub.s32 %v1435_v56, %v3619_v42  ;;  %v1505_v56 = vadd.s32 4294967200, %v3736_v52  ;;  %v3776_v32 = vsub.s32 %v1484_v14, %v3619_v42 }
 0x299   : > { %v1519_v25 = vadd.s32 4294967184, %v3736_v52  ;;  %v1526_v8 = vadd.s32 4294967176, %v3736_v52  ;;  %v3788_v31 = vsub.s32 %v1498_v29, %v3619_v42 }
 0x29a   : > { %1355 = vadd.xlane.f32.xlu0 %v1308_v63  ;;  %v1431_v63 = vsub.s32 %v1428_v62, %v3619_v42  ;;  %v1445_v15 = vsub.s32 %v1442_v59, %v3619_v42  ;;  %v1473_v59 = vsub.s32 %v1470_v49, %v3619_v42  ;;  %v3785_v49 = vsub.s32 %v1491_v28, %v3619_v42 }
 0x29b   : > { %v3793_v22 = vsub.s32 %v1505_v56, %v3619_v42  ;;  %v3807_v56 = vsub.s32 %v1519_v25, %v3619_v42 }
 0x29c   : > { %1387 = vadd.xlane.f32.xlu1 %v1324_v34 }
 0x2eb   : > { %v3701_v60 = vpop.xlane.xlu0 %1325 }
 0x2ed   : > { %v3703_v36 = vpop.xlane.xlu1 %1357 }
 0x2ee   : > { %v1536_v28 = vrot.slane %v3703_v36, %v1426_v61 }
 0x2ef   : > { %v3705_v38 = vpop.xlane.xlu0 %1327 }
 0x2f0   : > { %v1432_v33 = vrot.slane %v3705_v38, %v1431_v63  ;;  %v3798_v38 = vsub.s32 %v1512_v26, %v3619_v42  ;;  %v3810_v26 = vsub.s32 %v1526_v8, %v3619_v42 }
 0x2f1   : > { %v3707_v39 = vpop.xlane.xlu1 %1359 }
 0x2f2   : > { %v1540_v45 = vrot.slane %v3707_v39, %v1431_v63  ;;  %v1427_v39 = vrot.slane %v3701_v60, %v1426_v61 }
 0x2f3   : > { %v3709_v40 = vpop.xlane.xlu0 %1329 }
 0x2f4   : > { %v1439_v14 = vrot.slane %v3709_v40, %v1438_v30  ;;  %v1434_v60 = vsel %vm1433_vm2, %v1432_v33, %v1427_v39  ;;  %v1541_v36 = vsel %vm1433_vm2, %v1540_v45, %v1536_v28  ;;  %vm1391_vm2 = vcmp.lt.s32.totalorder %v3736_v52, 64  ;;  %v4200_v52 = vld [vmem:[#allocation8_spill] sm:$0xff] }
 0x2f5   : > { %v3711_v43 = vpop.xlane.xlu1 %1361 }
 0x2f6   : > { %v1545_v9 = vrot.slane %v3711_v43, %v1438_v30 }
 0x2f7   : > { %v3713_v44 = vpop.xlane.xlu0 %1331 }
 0x2f8   : > { %v1446_v29 = vrot.slane %v3713_v44, %v1445_v15 }
 0x2f9   : > { %v3715_v46 = vpop.xlane.xlu1 %1363 }
 0x2fa   : > { %v1550_v63 = vrot.slane %v3715_v46, %v1445_v15  ;;  %v1441_v46 = vsel %vm1440_vm3, %v1439_v14, %v1434_v60 }
 0x2fb   : > { %v3717_v47 = vpop.xlane.xlu0 %1333 }
 0x2fc   : > { %v1453_v30 = vrot.slane %v3717_v47, %v1452_v12 }
 0x2fd   : > { %v3719_v41 = vpop.xlane.xlu1 %1365 }
 0x2fe   : > { %v1555_v40 = vrot.slane %v3719_v41, %v1452_v12  ;;  %v1546_v12 = vsel %vm1440_vm3, %v1545_v9, %v1541_v36  ;;  %v1448_v41 = vsel %vm1447_vm4, %v1446_v29, %v1441_v46  ;;  %vm1616_vm3 = vcmask 1041408  }
 0x2ff   : > { %v3721_v37 = vpop.xlane.xlu0 %1335  ;;  %v1551_v61 = vsel %vm1447_vm4, %v1550_v63, %v1546_v12 }
 0x300   : > { %v1460_v44 = vrot.slane %v3721_v37, %v1459_v27 }
 0x301   : > { %v3723_v54 = vpop.xlane.xlu1 %1367 }
 0x302   : > { %v1560_v15 = vrot.slane %v3723_v54, %v1459_v27  ;;  %v1455_v27 = vsel %vm1454_vm5, %v1453_v30, %v1448_v41  ;;  %v1556_v54 = vsel %vm1454_vm5, %v1555_v40, %v1551_v61 }
 0x303   : > { %v3725_v48 = vpop.xlane.xlu0 %1337 }
 0x304   : > { %v1467_v47 = vrot.slane %v3725_v48, %v1466_v10  ;;  %v1561_v45 = vsel %vm1461_vm6, %v1560_v15, %v1556_v54  ;;  %v2556_v54 = vcombine.low %v3174_v0, %v3179_v1  ;;  %v2558_v0 = vcombine.low %v3194_v4, %v3202_v5 }
 0x305   : > { %v3727_v35 = vpop.xlane.xlu1 %1369  ;;  %v2566_v1 = vcombine.low %v3293_v20, %v3298_v21  ;;  %v4195_v20 = vld [vmem:[#allocation13_spill] sm:$0xff] }
 0x306   : > { %v1565_v25 = vrot.slane %v3727_v35, %v1466_v10  ;;  %v1462_v35 = vsel %vm1461_vm6, %v1460_v44, %v1455_v27  ;;  %2762 = vmatpush3.bf16.msra.mxu1 %v2556_v54  ;;  %v2906_v54 = vld [vmem:[%s4146_s8 + $0x64] ss:$16 sps:$4 sm:$0xff]  }
 0x307   : > { %v3729_v50 = vpop.xlane.xlu0 %1339 }
 0x308   : > { %v1474_v33 = vrot.slane %v3729_v50, %v1473_v59  ;;  %v1566_v14 = vsel %vm1468_vm7, %v1565_v25, %v1561_v45  ;;  %v4197_v45 = vld [vmem:[#allocation5_spill] sm:$0xff] }
 0x309   : > { %v3731_v58 = vpop.xlane.xlu1 %1371 }
 0x30a   : > { %v1570_v37 = vrot.slane %v3731_v58, %v1473_v59  ;;  %v1469_v59 = vsel %vm1468_vm7, %v1467_v47, %v1462_v35  ;;  %v4196_v35 = vld [vmem:[#allocation6_spill] sm:$0xff] }
 0x30b   : > { %v3733_v51 = vpop.xlane.xlu0 %1341  ;;  %v1476_v39 = vsel %vm1475_vm8, %v1474_v33, %v1469_v59  ;;  %v4199_v59 = vld [vmem:[#allocation15_spill] sm:$0xff] }
 0x30c   : > { %v1481_v9 = vrot.slane %v3733_v51, %v3773_v11  ;;  %v1571_v28 = vsel %vm1475_vm8, %v1570_v37, %v1566_v14 }
 0x30d   : > { %v3738_v53 = vpop.xlane.xlu1 %1373 }
 0x30e   : > { %v1575_v10 = vrot.slane %v3738_v53, %v3773_v11 }
 0x30f   : > { %v3741_v55 = vpop.xlane.xlu0 %1343 }
 0x310   : > { %v1488_v50 = vrot.slane %v3741_v55, %v3776_v32  ;;  %v1576_v29 = vsel %vm1482_vm9, %v1575_v10, %v1571_v28  ;;  %v2565_v10 = vcombine.low %v3283_v18, %v3288_v19  ;;  %v2559_v18 = vcombine.low %v3207_v6, %v3212_v7  ;;  %v4194_v19 = vld [vmem:[#allocation14_spill] sm:$0xff]  ;;  %v4205_v28 = vld [vmem:[#allocation9_spill] sm:$0xff] }
 0x311   : > { %v3744_v57 = vpop.xlane.xlu1 %1375  ;;  %v2567_v21 = vcombine.low %v4195_v20, %v4194_v19  ;;  %v4202_v7 = vld [vmem:[#allocation18_spill] sm:$0xff] }
 0x312   : > { %v1580_v58 = vrot.slane %v3744_v57, %v3776_v32  ;;  %v1483_v32 = vsel %vm1482_vm9, %v1481_v9, %v1476_v39  ;;  %v2557_v9 = vcombine.low %v3184_v2, %v3189_v3  ;;  %v4204_v39 = vld [vmem:[#allocation10_spill] sm:$0xff] }
 0x313   : > { %v3751_v34 = vpop.xlane.xlu0 %1345  ;;  %v1490_v63 = vsel %vm1489_vm10, %v1488_v50, %v1483_v32  ;;  %v2560_v50 = vcombine.low %v4197_v45, %v4196_v35  ;;  %v4207_v32 = vld [vmem:[#allocation19_spill] sm:$0xff]  ;;  %v2927_v19 = vld [vmem:[%s4146_s8 + $0xcc] ss:$16 sps:$4 sm:$0xff]   ;;  %v2922_v20 = vld [vmem:[%s4146_s8 + $0xc0] ss:$16 sps:$4 sm:$0xff]  }
 0x314   : > { %v1495_v51 = vrot.slane %v3751_v34, %v3785_v49  ;;  %v1581_v30 = vsel %vm1489_vm10, %v1580_v58, %v1576_v29  ;;  %v4198_v58 = vld [vmem:[#allocation16_spill] sm:$0xff]  ;;  %v2925_v35 = vld [vmem:[%s4146_s8 + $0xc8] ss:$16 sps:$4 sm:$0xff]  }
 0x315   : > { %v3759_v62 = vpop.xlane.xlu1 %1377  ;;  %v2568_v14 = vcombine.low %v4199_v59, %v4198_v58  ;;  %v2933_v45 = vld [vmem:[%s4146_s8 + $0xec] ss:$16 sps:$4 sm:$0xff]   ;;  %v2936_v58 = vld [vmem:[%s4146_s8 + $0x104] ss:$16 sps:$4 sm:$0xff]   ;;  %v2931_v59 = vld [vmem:[%s4146_s8 + $0xe8] ss:$16 sps:$4 sm:$0xff]  }
 0x316   : > { %v1585_v11 = vrot.slane %v3759_v62, %v3785_v49 }
 0x317   : > { %v3765_v13 = vpop.xlane.xlu0 %1347 }
 0x318   : > { %v1502_v55 = vrot.slane %v3765_v13, %v3788_v31 }
 0x319   : > { %v3778_v24 = vpop.xlane.xlu1 %1379 }
 0x31a   : > { %v1590_v57 = vrot.slane %v3778_v24, %v3788_v31  ;;  %v1497_v24 = vsel %vm1496_vm11, %v1495_v51, %v1490_v63  ;;  %v1586_v31 = vsel %vm1496_vm11, %v1585_v11, %v1581_v30  ;;  %v4201_v51 = vld [vmem:[#allocation7_spill] sm:$0xff]  ;;  %v4203_v11 = vld [vmem:[#allocation17_spill] sm:$0xff]  ;;  %v4210_v63 = vld [vmem:[#allocation22_spill] sm:$0xff] }
 0x31b   : > { %v3795_v23 = vpop.xlane.xlu0 %1349  ;;  %v2561_v6 = vcombine.low %v4201_v51, %v4200_v52  ;;  %v4211_v30 = vld [vmem:[#allocation21_spill] sm:$0xff]  ;;  %v2934_v52 = vld [vmem:[%s4146_s8 + $0x100] ss:$16 sps:$4 sm:$0xff]  }
 0x31c   : > { %v1509_v34 = vrot.slane %v3795_v23, %v3793_v22  ;;  %v2942_v51 = vld [vmem:[%s4146_s8 + $0x124] ss:$16 sps:$4 sm:$0xff]  }
 0x31d   : > { %v1382_v43 = vpop.xlane.xlu1 %1381 }
 0x31e   : > { %v1595_v62 = vrot.slane %v1382_v43, %v3793_v22  ;;  %v1504_v22 = vsel %vm1503_vm12, %v1502_v55, %v1497_v24  ;;  %v1591_v43 = vsel %vm1503_vm12, %v1590_v57, %v1586_v31  ;;  %v2562_v55 = vcombine.low %v4205_v28, %v4204_v39  ;;  %v4206_v57 = vld [vmem:[#allocation20_spill] sm:$0xff]  ;;  %v2943_v39 = vld [vmem:[%s4146_s8 + $0x128] ss:$16 sps:$4 sm:$0xff]  }
 0x31f   : > { %v1352_v8 = vpop.xlane.xlu0 %1351  ;;  %v1511_v15 = vsel %vm1510_vm13, %v1509_v34, %v1504_v22  ;;  %v2570_v29 = vcombine.low %v4207_v32, %v4206_v57  ;;  %v4208_v34 = vld [vmem:[#allocation12_spill] sm:$0xff]  ;;  %v2954_v57 = vld [vmem:[%s4146_s8 + $0x164] ss:$16 sps:$4 sm:$0xff]   ;;  %v2949_v32 = vld [vmem:[%s4146_s8 + $0x148] ss:$16 sps:$4 sm:$0xff]  }
 0x320   : > { %v1516_v40 = vrot.slane %v1352_v8, %v3798_v38  ;;  %v2891_v24 = vld [vmem:[%s4146_s8 + $0xc] ss:$16 sps:$4 sm:$0xff]  }
 0x321   : > { %v1384_v48 = vpop.xlane.xlu1 %1383  ;;  %v2951_v28 = vld [vmem:[%s4146_s8 + $0x14c] ss:$16 sps:$4 sm:$0xff]  }
 0x322   : > { %v1600_v13 = vrot.slane %v1384_v48, %v3798_v38  ;;  %v1596_v38 = vsel %vm1510_vm13, %v1595_v62, %v1591_v43  ;;  %v1518_v12 = vsel %vm1517_vm14, %v1516_v40, %v1511_v15  ;;  %v4193_v48 = vmov 0.0   ;;  %v4209_v62 = vld [vmem:[#allocation11_spill] sm:$0xff]  ;;  %v2886_v15 = vld [vmem:[%s4146_s8] ss:$16 sps:$4 sm:$0xff]  }
 0x323   : > { %v1354_v53 = vpop.xlane.xlu0 %1353  ;;  %2763 = vmatprep.subr.bf16.mxu1 %v4193_v48  ;;  %v2571_v40 = vcombine.low %v4211_v30, %v4210_v63  ;;  %v2963_v63 = vld [vmem:[%s4146_s8 + $0x18c] ss:$16 sps:$4 sm:$0xff]   ;;  %v2958_v30 = vld [vmem:[%s4146_s8 + $0x180] ss:$16 sps:$4 sm:$0xff]  }
 0x324   : > { %v1523_v60 = vrot.slane %v1354_v53, %v3807_v56  ;;  %v1601_v47 = vsel %vm1517_vm14, %v1600_v13, %v1596_v38  ;;  %2764 = vmatpush3.bf16.msra.mxu1 %v2557_v9  ;;  %v2569_v53 = vcombine.low %v4203_v11, %v4202_v7  ;;  %v2888_v13 = vld [vmem:[%s4146_s8 + $0x4] ss:$16 sps:$4 sm:$0xff]   ;;  %v2909_v9 = vld [vmem:[%s4146_s8 + $0x6c] ss:$16 sps:$4 sm:$0xff]   ;;  %v2940_v11 = vld [vmem:[%s4146_s8 + $0x120] ss:$16 sps:$4 sm:$0xff]  }
 0x325   : > { %v1386_v49 = vpop.xlane.xlu1 %1385  ;;  %2765 = vmatprep.subr.bf16.mxu1 %v4193_v48  ;;  %v2945_v7 = vld [vmem:[%s4146_s8 + $0x12c] ss:$16 sps:$4 sm:$0xff]  }
 0x326   : > { %v1605_v36 = vrot.slane %v1386_v49, %v3807_v56  ;;  %v1525_v25 = vsel %vm1524_vm15, %v1523_v60, %v1518_v12  ;;  %v2563_v49 = vcombine.low %v4209_v62, %v4208_v34  ;;  %v2894_v12 = vld [vmem:[%s4146_s8 + $0x24] ss:$16 sps:$4 sm:$0xff]   ;;  %v2952_v34 = vld [vmem:[%s4146_s8 + $0x160] ss:$16 sps:$4 sm:$0xff]  }
 0x327   : > { %v1356_v23 = vpop.xlane.xlu0 %1355  ;;  %v2960_v62 = vld [vmem:[%s4146_s8 + $0x184] ss:$16 sps:$4 sm:$0xff]  }
 0x328   : > { %v1530_v44 = vrot.slane %v1356_v23, %v3810_v26  ;;  %v1606_v8 = vsel %vm1524_vm15, %v1605_v36, %v1601_v47  ;;  %2766 = vmatpush3.bf16.msra.mxu1 %v2558_v0  ;;  %v4212_v23 = vld [vmem:[#allocation24_spill] sm:$0xff]  ;;  %v2889_v47 = vld [vmem:[%s4146_s8 + $0x8] ss:$16 sps:$4 sm:$0xff]  }
 0x329   : > { %v1388_v46 = vpop.xlane.xlu1 %1387  ;;  %2767 = vmatprep.subr.bf16.mxu1 %v4193_v48  ;;  %v2907_v0 = vld [vmem:[%s4146_s8 + $0x68] ss:$16 sps:$4 sm:$0xff]  }
 0x32a   : > { %v1610_v56 = vrot.slane %v1388_v46, %v3810_v26  ;;  %v1532_v41 = vsel %vm1531_vm0, %v1530_v44, %v1525_v25  ;;  %v2564_v26 = vcombine.low %v3273_v16, %v3278_v17  ;;  %v2897_v25 = vld [vmem:[%s4146_s8 + $0x2c] ss:$16 sps:$4 sm:$0xff]  }
 0x32c   : > { %v1611_v61 = vsel %vm1531_vm0, %v1610_v56, %v1606_v8  ;;  %2782 = vmatpush3.bf16.msra.mxu0 %v2564_v26  ;;  %2768 = vmatpush3.bf16.msra.mxu1 %v2559_v18  ;;  %v2892_v8 = vld [vmem:[%s4146_s8 + $0x20] ss:$16 sps:$4 sm:$0xff]   ;;  %v2901_v26 = vld [vmem:[%s4146_s8 + $0x48] ss:$16 sps:$4 sm:$0xff]  }
 0x32d   : > { %v1613_v33 = vsel %vm1612_vm1, %v1611_v61, %v1532_v41  ;;  %2783 = vmatprep.subr.bf16.mxu0 %v4193_v48  ;;  %2769 = vmatprep.subr.bf16.mxu1 %v4193_v48  ;;  %v4213_v41 = vld [vmem:[#allocation23_spill] sm:$0xff] }
 0x32e   : > { %v1615_v37 = vsel %vm1391_vm2, %v1613_v33, -1e+30  ;;  %v2900_v61 = vld [vmem:[%s4146_s8 + $0x44] ss:$16 sps:$4 sm:$0xff]   ;;  %v2895_v33 = vld [vmem:[%s4146_s8 + $0x28] ss:$16 sps:$4 sm:$0xff]  }
 0x32f   : > { %v1617_v27 = vsel %vm1616_vm3, %v1615_v37, -inf  ;;  %v2919_v18 = vld [vmem:[%s4146_s8 + $0xa8] ss:$16 sps:$4 sm:$0xff]  }
 0x330   : > { %1618 = vmax.xlane.f32.xlu0 %v1617_v27  ;;  %2784 = vmatpush3.bf16.msra.mxu0 %v2565_v10  ;;  %v2898_v27 = vld [vmem:[%s4146_s8 + $0x40] ss:$16 sps:$4 sm:$0xff]  }
 0x331   : > { %2785 = vmatprep.subr.bf16.mxu0 %v4193_v48  ;;  %2770 = vmatpush3.bf16.msra.mxu1 %v2560_v50  ;;  %v2904_v10 = vld [vmem:[%s4146_s8 + $0x60] ss:$16 sps:$4 sm:$0xff]  }
 0x332   : > { %2771 = vmatprep.subr.bf16.mxu1 %v4193_v48  ;;  %v2928_v50 = vld [vmem:[%s4146_s8 + $0xe0] ss:$16 sps:$4 sm:$0xff]  }
 0x334   : > { %2786 = vmatpush3.bf16.msra.mxu0 %v2566_v1  ;;  %v2915_v1 = vld [vmem:[%s4146_s8 + $0x8c] ss:$16 sps:$4 sm:$0xff]  }
 0x335   : > { %2787 = vmatprep.subr.bf16.mxu0 %v4193_v48  ;;  %2772 = vmatpush3.bf16.msra.mxu1 %v2561_v6  ;;  %v2937_v6 = vld [vmem:[%s4146_s8 + $0x108] ss:$16 sps:$4 sm:$0xff]  }
 0x336   : > { %2773 = vmatprep.subr.bf16.mxu1 %v4193_v48 }
 0x338   : > { %2788 = vmatpush3.bf16.msra.mxu0 %v2567_v21  ;;  %v2930_v21 = vld [vmem:[%s4146_s8 + $0xe4] ss:$16 sps:$4 sm:$0xff]  }
 0x339   : > { %2789 = vmatprep.subr.bf16.mxu0 %v4193_v48  ;;  %2774 = vmatpush3.bf16.msra.mxu1 %v2562_v55  ;;  %v2946_v55 = vld [vmem:[%s4146_s8 + $0x140] ss:$16 sps:$4 sm:$0xff]  }
 0x33a   : > { %2775 = vmatprep.subr.bf16.mxu1 %v4193_v48 }
 0x33c   : > { %2790 = vmatpush3.bf16.msra.mxu0 %v2568_v14  ;;  %v2939_v14 = vld [vmem:[%s4146_s8 + $0x10c] ss:$16 sps:$4 sm:$0xff]  }
 0x33d   : > { %2791 = vmatprep.subr.bf16.mxu0 %v4193_v48  ;;  %2776 = vmatpush3.bf16.msra.mxu1 %v2563_v49  ;;  %v2955_v49 = vld [vmem:[%s4146_s8 + $0x168] ss:$16 sps:$4 sm:$0xff]  }
 0x33e   : > { %2227 = vmatprep.subr.bf16.mxu1 %v2888_v13  ;;  %v2964_v13 = vld [vmem:[%s4146_s8 + $0x1a0] ss:$16 sps:$4 sm:$0xff]  }
 0x340   : > { %2792 = vmatpush3.bf16.msra.mxu0 %v2569_v53  ;;  %v2948_v53 = vld [vmem:[%s4146_s8 + $0x144] ss:$16 sps:$4 sm:$0xff]  }
 0x341   : > { %2793 = vmatprep.subr.bf16.mxu0 %v4193_v48 }
 0x344   : > { %2794 = vmatpush3.bf16.msra.mxu0 %v2570_v29  ;;  %v2957_v29 = vld [vmem:[%s4146_s8 + $0x16c] ss:$16 sps:$4 sm:$0xff]  }
 0x345   : > { %2795 = vmatprep.subr.bf16.mxu0 %v4193_v48  ;;  %v2912_v48 = vld [vmem:[%s4146_s8 + $0x84] ss:$16 sps:$4 sm:$0xff]  }
 0x348   : > { %2796 = vmatpush3.bf16.msra.mxu0 %v2571_v40  ;;  %v2961_v40 = vld [vmem:[%s4146_s8 + $0x188] ss:$16 sps:$4 sm:$0xff]  }
 0x349   : > { %2268 = vmatprep.subr.bf16.mxu0 %v2891_v24  ;;  %v2966_v24 = vld [vmem:[%s4146_s8 + $0x1a4] ss:$16 sps:$4 sm:$0xff]  }
 0x3bd   : > { %v1619_v2 = vpop.xlane.xlu0 %1618 }
 0x3be   : > { %v1620_v3 = vsub.f32 %v1615_v37, %v1619_v2  ;;  %v2903_v37 = vld [vmem:[%s4146_s8 + $0x4c] ss:$16 sps:$4 sm:$0xff]   ;;  %v2910_v2 = vld [vmem:[%s4146_s8 + $0x80] ss:$16 sps:$4 sm:$0xff]  }
 0x3c0   : > { %v1621_v16 = vmul.f32 1.442695, %v1620_v3  ;;  %v2918_v3 = vld [vmem:[%s4146_s8 + $0xa4] ss:$16 sps:$4 sm:$0xff]  }
 0x3c2   : > { %3046 = vpow2.f32 %v1621_v16  ;;  %v2913_v16 = vld [vmem:[%s4146_s8 + $0x88] ss:$16 sps:$4 sm:$0xff]  }
 0x3cc   : > { %v3047_v17 = vpop.eup %3046 }
 0x3cd   : > { %v1623_v4 = vsel %vm1391_vm2, %v3047_v17, 0.0  ;;  %v2921_v17 = vld [vmem:[%s4146_s8 + $0xac] ss:$16 sps:$4 sm:$0xff]  }
 0x3ce   : > { %v1624_v5 = vsel %vm1616_vm3, %v1623_v4, 0.0 }
 0x3cf   : > { %1625 = vadd.xlane.f32.xlu1 %v1624_v5  ;;  %v2924_v5 = vld [vmem:[%s4146_s8 + $0xc4] ss:$16 sps:$4 sm:$0xff]  }
 0x45c   : > { %v1626_v31 = vpop.xlane.xlu1 %1625 }
 0x45d   : > { %3048 = vrcp.f32 %v1626_v31  ;;  %v2967_v31 = vld [vmem:[%s4146_s8 + $0x1a8] ss:$16 sps:$4 sm:$0xff]  }
 0x467   : > { %v3049_v60 = vpop.eup %3048 }
 0x468   : > { %v1628_v36 = vmul.f32 %v3049_v60, %v1623_v4  ;;  %v2916_v4 = vld [vmem:[%s4146_s8 + $0xa0] ss:$16 sps:$4 sm:$0xff]   ;;  %v2969_v60 = vld [vmem:[%s4146_s8 + $0x1ac] ss:$16 sps:$4 sm:$0xff]  }
 0x46a   : > { %v1636_v22 = vrot.slane %v1628_v36, %v4212_v23  ;;  %2367 = vst [vmem:[%s3258_s28] sm:$0x3] %v1628_v36  ;;  %v2970_v36 = vld [vmem:[%s4146_s8 + $0x1c0] ss:$16 sps:$4 sm:$0xff]  }
 0x46c   : > { %v1637_v43 = vcombine.high %v1636_v22, %v1636_v22  ;;  %v1644_v44 = vrot.slane %v1636_v22, %v4212_v23  ;;  %v2973_v22 = vld [vmem:[%s4146_s8 + $0x1c8] ss:$16 sps:$4 sm:$0xff]  }
 0x46e   : > { %v1654_v38 = vpack.c.bf16 %v1644_v44, %v1644_v44  ;;  %v1651_v46 = vrot.slane %v1637_v43, %v4212_v23  ;;  %v2972_v23 = vld [vmem:[%s4146_s8 + $0x1c4] ss:$16 sps:$4 sm:$0xff]   ;;  %v2975_v43 = vld [vmem:[%s4146_s8 + $0x1cc] ss:$16 sps:$4 sm:$0xff]  }
 0x46f   : > { %v2978_v44 = vld [vmem:[%s4146_s8 + $0x1e4] ss:$16 sps:$4 sm:$0xff]  }
 0x470   : > { %2778 = vmatmul.mubr.bf16.vlgmr.msra.gmra.mrb[0].mxu1 %v1654_v38  ;;  %v1655_v56 = vpack.c.bf16 %v1651_v46, %v1651_v46  ;;  %v2976_v38 = vld [vmem:[%s4146_s8 + $0x1e0] ss:$16 sps:$4 sm:$0xff]   ;;  %v2979_v46 = vld [vmem:[%s4146_s8 + $0x1e8] ss:$16 sps:$4 sm:$0xff]  }
 0x471   : > { %2228 = vmatpush1.bf16.msra.mxu1 %v2886_v15  ;;  %2259 = vmatprep.mubr.bf16.mxu1 %v4213_v41  ;;  %v2981_v15 = vld [vmem:[%s4146_s8 + $0x1ec] ss:$16 sps:$4 sm:$0xff]  }
 0x472   : > { %2798 = vmatmul.mubr.bf16.vlgmr.msra.gmra.mrb[4].mxu0 %v1655_v56  ;;  %2229 = vmatprep.subr.bf16.mxu1 %v2894_v12 }
 0x473   : > { %2269 = vmatpush1.bf16.msra.mxu0 %v2889_v47  ;;  %2300 = vmatprep.mubr.bf16.mxu0 %v4213_v41 }
 0x474   : > { %2270 = vmatprep.subr.bf16.mxu0 %v2897_v25 }
 0x475   : > { %2230 = vmatpush1.bf16.msra.mxu1 %v2892_v8 }
 0x476   : > { %2231 = vmatprep.subr.bf16.mxu1 %v2900_v61 }
 0x477   : > { %2271 = vmatpush1.bf16.msra.mxu0 %v2895_v33 }
 0x478   : > { %2272 = vmatprep.subr.bf16.mxu0 %v2903_v37 }
 0x479   : > { %2232 = vmatpush1.bf16.msra.mxu1 %v2898_v27 }
 0x47a   : > { %2233 = vmatprep.subr.bf16.mxu1 %v2906_v54 }
 0x47b   : > { %2273 = vmatpush1.bf16.msra.mxu0 %v2901_v26 }
 0x47c   : > { %2274 = vmatprep.subr.bf16.mxu0 %v2909_v9 }
 0x47d   : > { %2234 = vmatpush1.bf16.msra.mxu1 %v2904_v10 }
 0x47e   : > { %2235 = vmatprep.subr.bf16.mxu1 %v2912_v48 }
 0x47f   : > { %2275 = vmatpush1.bf16.msra.mxu0 %v2907_v0  ;;  %v3094_v0 = vmov 1983009808  }
 0x480   : > { %2276 = vmatprep.subr.bf16.mxu0 %v2915_v1  ;;  %v2316_v1 = vunpack.c.l.s4 %v3094_v0 }
 0x481   : > { %2236 = vmatpush1.bf16.msra.mxu1 %v2910_v2 }
 0x482   : > { %2237 = vmatprep.subr.bf16.mxu1 %v2918_v3  ;;  %v2317_v2 = vunpack.c.0.s8 %v2316_v1 }
 0x483   : > { %2277 = vmatpush1.bf16.msra.mxu0 %v2913_v16 }
 0x484   : > { %2278 = vmatprep.subr.bf16.mxu0 %v2921_v17  ;;  %v2320_v17 = vsub.s32 %v2317_v2, %v3619_v42 }
 0x485   : > { %2238 = vmatpush1.bf16.msra.mxu1 %v2916_v4 }
 0x486   : > { %2239 = vmatprep.subr.bf16.mxu1 %v2924_v5 }
 0x487   : > { %2279 = vmatpush1.bf16.msra.mxu0 %v2919_v18 }
 0x488   : > { %2280 = vmatprep.subr.bf16.mxu0 %v2927_v19 }
 0x489   : > { %2240 = vmatpush1.bf16.msra.mxu1 %v2922_v20 }
 0x48a   : > { %2241 = vmatprep.subr.bf16.mxu1 %v2930_v21 }
 0x48b   : > { %2281 = vmatpush1.bf16.msra.mxu0 %v2925_v35 }
 0x48c   : > { %2282 = vmatprep.subr.bf16.mxu0 %v2933_v45 }
 0x48d   : > { %2242 = vmatpush1.bf16.msra.mxu1 %v2928_v50 }
 0x48e   : > { %2243 = vmatprep.subr.bf16.mxu1 %v2936_v58 }
 0x48f   : > { %2283 = vmatpush1.bf16.msra.mxu0 %v2931_v59  ;;  %v1842_v59 = vld [vmem:[%s3242_s17] sm:$0xff] }
 0x490   : > { %2284 = vmatprep.subr.bf16.mxu0 %v2939_v14 }
 0x491   : > { %2244 = vmatpush1.bf16.msra.mxu1 %v2934_v52 }
 0x492   : > { %2245 = vmatprep.subr.bf16.mxu1 %v2942_v51 }
 0x493   : > { %2285 = vmatpush1.bf16.msra.mxu0 %v2937_v6 }
 0x494   : > { %2286 = vmatprep.subr.bf16.mxu0 %v2945_v7 }
 0x495   : > { %2246 = vmatpush1.bf16.msra.mxu1 %v2940_v11 }
 0x496   : > { %2247 = vmatprep.subr.bf16.mxu1 %v2948_v53 }
 0x497   : > { %2287 = vmatpush1.bf16.msra.mxu0 %v2943_v39 }
 0x498   : > { %2288 = vmatprep.subr.bf16.mxu0 %v2951_v28 }
 0x499   : > { %2248 = vmatpush1.bf16.msra.mxu1 %v2946_v55 }
 0x49a   : > { %2249 = vmatprep.subr.bf16.mxu1 %v2954_v57 }
 0x49b   : > { %2289 = vmatpush1.bf16.msra.mxu0 %v2949_v32 }
 0x49c   : > { %2290 = vmatprep.subr.bf16.mxu0 %v2957_v29 }
 0x49d   : > { %2250 = vmatpush1.bf16.msra.mxu1 %v2952_v34  ;;  %v1051_v34 = vld [vmem:[#allocation3] sm:$0x3] }
 0x49e   : > { %2251 = vmatprep.subr.bf16.mxu1 %v2960_v62 }
 0x49f   : > { %2291 = vmatpush1.bf16.msra.mxu0 %v2955_v49 }
 0x4a0   : > { %2292 = vmatprep.subr.bf16.mxu0 %v2963_v63 }
 0x4a1   : > { %2252 = vmatpush1.bf16.msra.mxu1 %v2958_v30 }
 0x4a2   : > { %2253 = vmatprep.subr.bf16.mxu1 %v2966_v24 }
 0x4a3   : > { %2293 = vmatpush1.bf16.msra.mxu0 %v2961_v40 }
 0x4a4   : > { %2294 = vmatprep.subr.bf16.mxu0 %v2969_v60 }
 0x4a5   : > { %2254 = vmatpush1.bf16.msra.mxu1 %v2964_v13 }
 0x4a6   : > { %2255 = vmatprep.subr.bf16.mxu1 %v2972_v23 }
 0x4a7   : > { %2295 = vmatpush1.bf16.msra.mxu0 %v2967_v31 }
 0x4a8   : > { %2296 = vmatprep.subr.bf16.mxu0 %v2975_v43 }
 0x4a9   : > { %2256 = vmatpush1.bf16.msra.mxu1 %v2970_v36 }
 0x4aa   : > { %2257 = vmatprep.subr.bf16.mxu1 %v2978_v44 }
 0x4ab   : > { %2297 = vmatpush1.bf16.msra.mxu0 %v2973_v22 }
 0x4ac   : > { %2298 = vmatprep.subr.bf16.mxu0 %v2981_v15 }
 0x4ad   : > { %2258 = vmatpush1.bf16.msra.mxu1 %v2976_v38 }
 0x4af   : > { %2299 = vmatpush1.bf16.msra.mxu0 %v2979_v46 }
 0x543   : > { %v1738_v12 = vpop.f32.mrb[0].mxu1 }
 0x544   : > { %v2779_v47 = vpop.f32.mrb[1].mxu1  ;;  %v1832_v8 = vpack.c.bf16 %v1738_v12, %v1738_v12 }
 0x545   : > { %v1741_v56 = vpop.f32.mrb[2].mxu1  ;;  %v1826_v25 = vpop.f32.mrb[4].mxu0 }
 0x546   : > { %v1833_v41 = vpack.c.bf16 %v1826_v25, %v1826_v25  ;;  %v2780_v61 = vpop.f32.mrb[3].mxu1  ;;  %v2799_v33 = vpop.f32.mrb[5].mxu0  ;;  %v1836_v26 = vunpack.c.l.b16 %v1832_v8 }
 0x547   : > { %v1829_v37 = vpop.f32.mrb[6].mxu0 }
 0x548   : > { %v1837_v27 = vunpack.c.l.b16 %v1833_v41  ;;  %v2800_v54 = vpop.f32.mrb[7].mxu0 }
 0x54a   : > { %v1838_v9 = vrot.slane %v1837_v27, 7 }
 0x54c   : > { %v1839_v10 = vsel %vm1612_vm1, %v1838_v9, %v1836_v26 }
 0x54d   : > { %v1840_v48 = vpack.c.b16 %v1839_v10, %v1839_v10 }
 0x54f   : > { %2260 = vmatmul.mubr.bf16.vlgmr.msra.gmra.mrb[4].mxu1 %v1840_v48  ;;  %2301 = vmatmul.mubr.bf16.vlgmr.msra.gmra.mrb[8].mxu0 %v1840_v48 }
 0x622   : > { %v2261_v3 = vpop.f32.mrb[4].mxu1  ;;  %v2302_v16 = vpop.f32.mrb[8].mxu0 }
 0x623   : > { %v2263_v4 = vpop.f32.mrb[5].mxu1  ;;  %v2304_v5 = vpop.f32.mrb[9].mxu0 }
 0x624   : > { %v2313_v18 = vcombine.low %v2261_v3, %v2263_v4  ;;  %v2314_v19 = vcombine.low %v2302_v16, %v2304_v5  ;;  %v2265_v20 = vpop.f32.mrb[6].mxu1  ;;  %v2306_v21 = vpop.f32.mrb[10].mxu0 }
 0x625   : > { %v2266_v35 = vpop.f32.mrb[7].mxu1  ;;  %v2307_v45 = vpop.f32.mrb[11].mxu0 }
 0x626   : > { %v2321_v50 = vrot.slane %v2313_v18, %v2320_v17  ;;  %v2328_v58 = vrot.slane %v2314_v19, %v2320_v17 }
 0x628   : > { %v2329_v14 = vcombine.low %v2321_v50, %v2328_v58 }
 0x62a   : > { %v2331_v52 = vadd.f32 %v2329_v14, %v1842_v59 }
 0x62c   : > { %v2636_v51 = vmul.f32 -1.442695, %v2331_v52  ;;  %v2339_v6 = vrot.slane %v2331_v52, 2  ;;  %v2350_v11 = vrot.slane %v2331_v52, 6  ;;  %v2347_v39 = vrot.slane %v2331_v52, 4 }
 0x62e   : > { %3050 = vpow2.f32 %v2636_v51  ;;  %v2637_v7 = vmul.f32 -1.442695, %v2339_v6  ;;  %v2638_v42 = vmul.f32 -1.442695, %v2350_v11 }
 0x630   : > { %3052 = vpow2.f32 %v2637_v7 }
 0x631   : > { %3054 = vpow2.f32 %v2638_v42 }
 0x638   : > { %v3051_v53 = vpop.eup %3050 }
 0x639   : > { %v2335_v28 = vadd.f32 1.0, %v3051_v53 }
 0x63a   : > { %v3053_v55 = vpop.eup %3052 }
 0x63b   : > { %3056 = vrcp.f32 %v2335_v28  ;;  %v2344_v57 = vadd.f32 1.0, %v3053_v55  ;;  %v3055_v32 = vpop.eup %3054 }
 0x63c   : > { %3058 = vtanh.f32 %v2347_v39  ;;  %v2355_v63 = vadd.f32 1.0, %v3055_v32 }
 0x63d   : > { %3060 = vrcp.f32 %v2344_v57 }
 0x63e   : > { %3062 = vrcp.f32 %v2355_v63 }
 0x645   : > { %v3057_v29 = vpop.eup %3056 }
 0x646   : > { %v3059_v62 = vpop.eup %3058 }
 0x647   : > { %v3061_v49 = vpop.eup %3060  ;;  %v2359_v40 = vmul.f32 %v3059_v62, %v3057_v29 }
 0x648   : > { %v2358_v30 = vmul.f32 %v3061_v49, %v1051_v34  ;;  %v3063_v24 = vpop.eup %3062 }
 0x64a   : > { %v2360_v13 = vadd.f32 %v2359_v40, %v2358_v30 }
 0x64c   : > { %3064 = vtanh.f32 %v2360_v13  ;;  %2364 = vst [vmem:[#allocation3] sm:$0x3] %v2360_v13 }
 0x656   : > { %v3065_v31 = vpop.eup %3064 }
 0x657   : > { %v2362_v60 = vmul.f32 %v3065_v31, %v3063_v24 }
 0x659   : > { %2363 = vst [vmem:[#allocation2] sm:$0x3] %v2362_v60  ;;  %v2365_v36 = vpack.c.bf16 %v2362_v60, %v2362_v60 }
 0x65b   : > { %2366 = vst [vmem:[%s404_s25] sm:$0x1] %v2365_v36 }
 0x65c PF: > { %s21_s15 = sadd.s32 1, %s3088_s15   ;;  %s4214_s13 = smov %s3084_s14 }
 0x65d   : > { %p18_p6 = scmp.ge.s32.totalorder %s21_s15, 10   ;;  %s4215_s14 = smov %s4217_s16 }
 0x65f   :  { %20 = sbr.rel (!%p18_p6) target bundleno = 2 (0x2), region = 103 }

</bundles_post_ra>
